<compile_context>
chip_gen: v7x
topology: tpu7x:2x2x1
jax: 0.10.0
libtpu: 0.0.40
codegen_flags: <defaults>
</compile_context>

<pallas_src>
import functools

import jax
import jax.numpy as jnp
import numpy as np
from jax.experimental import pallas as pl
from jax.experimental.pallas import tpu as pltpu


def _pick_row_tile(OH, OW, max_m=512):
    """Largest divisor TM of OH with TM*OW <= max_m and TM*OW % 8 == 0."""
    best = None
    for tm in range(1, OH + 1):
        if OH % tm != 0:
            continue
        m = tm * OW
        if m <= max_m and (m % 8 == 0 or tm == OH):
            best = tm
    if best is None:
        best = OH            # single row tile; block equals full dim
    return best


def _conv_im2col_kernel(x_ref, w_ref, b_ref, o_ref, p_ref, *,
                        K, stride, TM, OW, Cin, tn):
    # x_ref: (1, 1, TM_in, WP, Cin)  one overlapping input row tile (compute dtype)
    # w_ref: (KKC, Coutp)            full folded weight, resident (constant block)
    # b_ref: (1, Coutp)              f32 bias (zero-padded lanes)
    # o_ref: (1, TM*OW, tn)          output tile (lane-dense)
    # p_ref: VMEM scratch (TM, OW, KKC)  im2col patch, reused across Cout tiles
    j = pl.program_id(2)
    KKC = K * K * Cin
    M = TM * OW

    @pl.when(j == 0)
    def _build_patch():                       # once per (image, row-tile)
        for kh in range(K):                   # K*K static, unrolled
            for kw in range(K):
                if stride == 1:
                    win = x_ref[0, 0, kh:kh + TM, kw:kw + OW, :]
                else:
                    rows = (TM - 1) * stride + 1
                    cols = (OW - 1) * stride + 1
                    win = jax.lax.slice(
                        x_ref[0, 0, kh:kh + rows, kw:kw + cols, :],
                        (0, 0, 0), (rows, cols, Cin), (stride, stride, 1))
                c0 = (kh * K + kw) * Cin
                p_ref[:, :, c0:c0 + Cin] = win

    jm = pl.multiple_of(j * tn, tn)                       # 128-aligned lane offset
    w_tile = w_ref[:, pl.ds(jm, tn)]                      # (KKC, tn)
    patch = p_ref[...].reshape(M, KKC)                    # cheap outer-dim merge
    acc = jnp.dot(patch, w_tile, preferred_element_type=jnp.float32)
    acc = acc + b_ref[:, pl.ds(jm, tn)]                   # bias once, f32 epilogue
    o_ref[0] = acc.astype(o_ref.dtype)


def default_conv2d(x, weight, bias=None, *, stride=1, padding=0,
                   compute_dtype=jnp.bfloat16, tn=128, max_rows_per_tile=512):
    """Equivalent of DefaultConv2d.forward.

    x:      (B, Cin, H, W)    float32
    weight: (Cout, Cin, K, K) float32
    bias:   (Cout,) float32 or None
    returns (B, Cout, OH, OW) in x.dtype
    """
    B, Cin, H, W = x.shape
    Cout, Cin_w, K, K2 = weight.shape
    assert Cin_w == Cin and K == K2
    assert tn % 128 == 0
    OH = (H + 2 * padding - K) // stride + 1
    OW = (W + 2 * padding - K) // stride + 1
    assert OH >= 1 and OW >= 1
    HP, WP = H + 2 * padding, W + 2 * padding
    KKC = K * K * Cin
    Coutp = ((Cout + tn - 1) // tn) * tn
    NT = Coutp // tn

    TM = _pick_row_tile(OH, OW, max_rows_per_tile)
    RT = OH // TM
    TM_in = (TM - 1) * stride + K

    # ---- layout glue (XLA side) ----
    xh = jnp.transpose(x, (0, 2, 3, 1))                       # NCHW -> NHWC
    if padding > 0:
        xh = jnp.pad(xh, ((0, 0), (padding, padding),
                          (padding, padding), (0, 0)))
    xh = xh.astype(compute_dtype)
    # Overlapping output-row tiles (halo = K - stride rows) so each grid step
    # only keeps a small row tile resident in VMEM (not the whole image).
    row_idx = (jnp.arange(RT) * (TM * stride))[:, None] + jnp.arange(TM_in)[None, :]
    x_tiles = xh[:, row_idx]                                  # (B, RT, TM_in, WP, Cin)

    # OIHW -> (kh, kw, cin, cout) -> folded (K*K*Cin, Coutp), lane-dense Cout.
    w2 = jnp.transpose(weight, (2, 3, 1, 0)).reshape(KKC, Cout)
    w2 = jnp.pad(w2, ((0, 0), (0, Coutp - Cout))).astype(compute_dtype)
    if bias is None:
        b2 = jnp.zeros((1, Coutp), jnp.float32)
    else:
        b2 = jnp.pad(bias.astype(jnp.float32).reshape(1, Cout),
                     ((0, 0), (0, Coutp - Cout)))

    out_dtype = jnp.dtype(compute_dtype)
    isz = jnp.dtype(compute_dtype).itemsize

    def _rup(v, m):
        return ((v + m - 1) // m) * m

    # VMEM budget (double-buffered inputs/outputs + scratch + accumulator).
    x_tile_bytes = TM_in * _rup(WP, 8) * _rup(Cin, 128) * isz
    w_bytes = _rup(KKC, 8) * Coutp * isz
    o_tile_bytes = _rup(TM * OW, 8) * tn * out_dtype.itemsize
    p_bytes = TM * _rup(OW, 8) * _rup(KKC, 128) * isz
    acc_bytes = _rup(TM * OW, 8) * tn * 4
    est = 2 * (x_tile_bytes + w_bytes + o_tile_bytes) + p_bytes + acc_bytes + (4 << 20)
    vmem_limit = min(64 << 20, max(32 << 20, int(est)))

    flops = 2 * B * OH * OW * KKC * Coutp
    bytes_accessed = (B * RT * TM_in * WP * Cin * isz + KKC * Coutp * isz
                      + Coutp * 4 + B * OH * OW * Coutp * out_dtype.itemsize)

    kernel = functools.partial(_conv_im2col_kernel, K=K, stride=stride,
                               TM=TM, OW=OW, Cin=Cin, tn=tn)

    out = pl.pallas_call(
        kernel,
        out_shape=jax.ShapeDtypeStruct((B, OH * OW, Coutp), out_dtype),
        grid=(B, RT, NT),
        in_specs=[
            pl.BlockSpec((1, 1, TM_in, WP, Cin), lambda b, rt, j: (b, rt, 0, 0, 0)),
            pl.BlockSpec((KKC, Coutp), lambda b, rt, j: (0, 0)),
            pl.BlockSpec((1, Coutp), lambda b, rt, j: (0, 0)),
        ],
        out_specs=pl.BlockSpec((1, TM * OW, tn), lambda b, rt, j: (b, rt, j)),
        scratch_shapes=[pltpu.VMEM((TM, OW, KKC), compute_dtype)],
        compiler_params=pltpu.CompilerParams(
            dimension_semantics=("parallel", "parallel", "arbitrary"),
            vmem_limit_bytes=vmem_limit),
        cost_estimate=pl.CostEstimate(flops=flops, transcendentals=0,
                                      bytes_accessed=int(bytes_accessed)),
    )(x_tiles, w2, b2)

    out = out[:, :, :Cout].reshape(B, OH, OW, Cout)           # drop lane pad
    return jnp.transpose(out, (0, 3, 1, 2)).astype(x.dtype)   # NHWC -> NCHW


if __name__ == "__main__":
    # DefaultConv2d(in_channels=4, out_channels=8, kernel_size=3, stride=1, padding=1)
    B, Cin, H, W = 2, 4, 16, 16
    Cout, K, stride, padding = 8, 3, 1, 1

    key = jax.random.PRNGKey(0)
    kx, kwt, kb = jax.random.split(key, 3)
    x = jax.random.normal(kx, (B, Cin, H, W), dtype=jnp.float32)
    weight = jax.random.normal(kwt, (Cout, Cin, K, K), dtype=jnp.float32)
    bias = jax.random.normal(kb, (Cout,), dtype=jnp.float32)

    # Reference (same semantics as the PyTorch module).
    ref = jax.lax.conv_general_dilated(
        x, weight,
        window_strides=(stride, stride),
        padding=((padding, padding), (padding, padding)),
        dimension_numbers=("NCHW", "OIHW", "NCHW"),
    ) + bias.reshape(1, Cout, 1, 1)

    # f32 compute path: strict check.
    fn32 = jax.jit(functools.partial(default_conv2d, stride=stride,
                                     padding=padding,
                                     compute_dtype=jnp.float32))
    out32 = jax.block_until_ready(fn32(x, weight, bias))
    np.testing.assert_allclose(np.asarray(out32), np.asarray(ref),
                               rtol=1e-4, atol=1e-4)

    # bf16 compute / f32 accumulate path (MXU fast path): loose check.
    fnbf = jax.jit(functools.partial(default_conv2d, stride=stride,
                                     padding=padding,
                                     compute_dtype=jnp.bfloat16))
    outbf = jax.block_until_ready(fnbf(x, weight, bias))
    np.testing.assert_allclose(np.asarray(outbf.astype(jnp.float32)),
                               np.asarray(ref), rtol=5e-2, atol=3e-1)

    assert out32.shape == (B, Cout, H, W)
    print("KERNEL_OK")
</pallas_src>

<mosaic_0001>
module attributes {stable_mosaic.version = 11 : i64} {
  func.func @_conv_im2col_kernel(%arg0: i32, %arg1: i32, %arg2: i32, %arg3: memref<1x1x18x18x4xf32, #tpu.memory_space<vmem>>, %arg4: memref<36x128xf32, #tpu.memory_space<vmem>>, %arg5: memref<1x128xf32, #tpu.memory_space<vmem>>, %arg6: memref<1x256x128xf32, #tpu.memory_space<vmem>>, %arg7: memref<16x16x36xf32, #tpu.memory_space<vmem>>) attributes {dimension_semantics = [#tpu.dimension_semantics<parallel>, #tpu.dimension_semantics<parallel>, #tpu.dimension_semantics<arbitrary>], iteration_bounds = array<i64: 2, 1, 1>, scalar_prefetch = 0 : i64, scratch_operands = 1 : i64, tpu.core_type = #tpu.core_type<tc>, window_params = [{transform_indices = @transform_0, window_bounds = array<i64: 1, 1, 18, 18, 4>}, {pipeline_mode = #tpu.pipeline_mode<synchronous>, transform_indices = @transform_1, window_bounds = array<i64: 36, 128>}, {pipeline_mode = #tpu.pipeline_mode<synchronous>, transform_indices = @transform_2, window_bounds = array<i64: 1, 128>}, {transform_indices = @transform_3, window_bounds = array<i64: 1, 256, 128>}]} {
    %c0_i32 = arith.constant 0 : i32
    %0 = arith.cmpi eq, %arg2, %c0_i32 : i32
    %1 = arith.extui %0 : i1 to i32
    %c0_i32_0 = arith.constant 0 : i32
    %2 = arith.cmpi ne, %1, %c0_i32_0 : i32
    scf.if %2 {
      %c0_8 = arith.constant 0 : index
      %c0_9 = arith.constant 0 : index
      %c0_10 = arith.constant 0 : index
      %c0_11 = arith.constant 0 : index
      %c0_12 = arith.constant 0 : index
      %17 = vector.load %arg3[%c0_8, %c0_9, %c0_10, %c0_11, %c0_12] : memref<1x1x18x18x4xf32, #tpu.memory_space<vmem>>, vector<1x1x16x16x4xf32>
      %18 = vector.shape_cast %17 : vector<1x1x16x16x4xf32> to vector<16x16x4xf32>
      %c0_13 = arith.constant 0 : index
      %c0_14 = arith.constant 0 : index
      %c0_15 = arith.constant 0 : index
      %19 = vector.load %arg7[%c0_13, %c0_14, %c0_15] : memref<16x16x36xf32, #tpu.memory_space<vmem>>, vector<16x16x4xf32>
      tpu.vector_store %arg7[%c0_13, %c0_14, %c0_15], %18 {strides = array<i32>} : memref<16x16x36xf32, #tpu.memory_space<vmem>>, vector<16x16x4xf32>,
      %c0_16 = arith.constant 0 : index
      %c0_17 = arith.constant 0 : index
      %c0_18 = arith.constant 0 : index
      %c1 = arith.constant 1 : index
      %c0_19 = arith.constant 0 : index
      %20 = vector.load %arg3[%c0_16, %c0_17, %c0_18, %c1, %c0_19] : memref<1x1x18x18x4xf32, #tpu.memory_space<vmem>>, vector<1x1x16x16x4xf32>
      %21 = vector.shape_cast %20 : vector<1x1x16x16x4xf32> to vector<16x16x4xf32>
      %c0_20 = arith.constant 0 : index
      %c0_21 = arith.constant 0 : index
      %c4 = arith.constant 4 : index
      %22 = vector.load %arg7[%c0_20, %c0_21, %c4] : memref<16x16x36xf32, #tpu.memory_space<vmem>>, vector<16x16x4xf32>
      tpu.vector_store %arg7[%c0_20, %c0_21, %c4], %21 {strides = array<i32>} : memref<16x16x36xf32, #tpu.memory_space<vmem>>, vector<16x16x4xf32>,
      %c0_22 = arith.constant 0 : index
      %c0_23 = arith.constant 0 : index
      %c0_24 = arith.constant 0 : index
      %c2 = arith.constant 2 : index
      %c0_25 = arith.constant 0 : index
      %23 = vector.load %arg3[%c0_22, %c0_23, %c0_24, %c2, %c0_25] : memref<1x1x18x18x4xf32, #tpu.memory_space<vmem>>, vector<1x1x16x16x4xf32>
      %24 = vector.shape_cast %23 : vector<1x1x16x16x4xf32> to vector<16x16x4xf32>
      %c0_26 = arith.constant 0 : index
      %c0_27 = arith.constant 0 : index
      %c8 = arith.constant 8 : index
      %25 = vector.load %arg7[%c0_26, %c0_27, %c8] : memref<16x16x36xf32, #tpu.memory_space<vmem>>, vector<16x16x4xf32>
      tpu.vector_store %arg7[%c0_26, %c0_27, %c8], %24 {strides = array<i32>} : memref<16x16x36xf32, #tpu.memory_space<vmem>>, vector<16x16x4xf32>,
      %c0_28 = arith.constant 0 : index
      %c0_29 = arith.constant 0 : index
      %c1_30 = arith.constant 1 : index
      %c0_31 = arith.constant 0 : index
      %c0_32 = arith.constant 0 : index
      %26 = vector.load %arg3[%c0_28, %c0_29, %c1_30, %c0_31, %c0_32] : memref<1x1x18x18x4xf32, #tpu.memory_space<vmem>>, vector<1x1x16x16x4xf32>
      %27 = vector.shape_cast %26 : vector<1x1x16x16x4xf32> to vector<16x16x4xf32>
      %c0_33 = arith.constant 0 : index
      %c0_34 = arith.constant 0 : index
      %c12 = arith.constant 12 : index
      %28 = vector.load %arg7[%c0_33, %c0_34, %c12] : memref<16x16x36xf32, #tpu.memory_space<vmem>>, vector<16x16x4xf32>
      tpu.vector_store %arg7[%c0_33, %c0_34, %c12], %27 {strides = array<i32>} : memref<16x16x36xf32, #tpu.memory_space<vmem>>, vector<16x16x4xf32>,
      %c0_35 = arith.constant 0 : index
      %c0_36 = arith.constant 0 : index
      %c1_37 = arith.constant 1 : index
      %c1_38 = arith.constant 1 : index
      %c0_39 = arith.constant 0 : index
      %29 = vector.load %arg3[%c0_35, %c0_36, %c1_37, %c1_38, %c0_39] : memref<1x1x18x18x4xf32, #tpu.memory_space<vmem>>, vector<1x1x16x16x4xf32>
      %30 = vector.shape_cast %29 : vector<1x1x16x16x4xf32> to vector<16x16x4xf32>
      %c0_40 = arith.constant 0 : index
      %c0_41 = arith.constant 0 : index
      %c16 = arith.constant 16 : index
      %31 = vector.load %arg7[%c0_40, %c0_41, %c16] : memref<16x16x36xf32, #tpu.memory_space<vmem>>, vector<16x16x4xf32>
      tpu.vector_store %arg7[%c0_40, %c0_41, %c16], %30 {strides = array<i32>} : memref<16x16x36xf32, #tpu.memory_space<vmem>>, vector<16x16x4xf32>,
      %c0_42 = arith.constant 0 : index
      %c0_43 = arith.constant 0 : index
      %c1_44 = arith.constant 1 : index
      %c2_45 = arith.constant 2 : index
      %c0_46 = arith.constant 0 : index
      %32 = vector.load %arg3[%c0_42, %c0_43, %c1_44, %c2_45, %c0_46] : memref<1x1x18x18x4xf32, #tpu.memory_space<vmem>>, vector<1x1x16x16x4xf32>
      %33 = vector.shape_cast %32 : vector<1x1x16x16x4xf32> to vector<16x16x4xf32>
      %c0_47 = arith.constant 0 : index
      %c0_48 = arith.constant 0 : index
      %c20 = arith.constant 20 : index
      %34 = vector.load %arg7[%c0_47, %c0_48, %c20] : memref<16x16x36xf32, #tpu.memory_space<vmem>>, vector<16x16x4xf32>
      tpu.vector_store %arg7[%c0_47, %c0_48, %c20], %33 {strides = array<i32>} : memref<16x16x36xf32, #tpu.memory_space<vmem>>, vector<16x16x4xf32>,
      %c0_49 = arith.constant 0 : index
      %c0_50 = arith.constant 0 : index
      %c2_51 = arith.constant 2 : index
      %c0_52 = arith.constant 0 : index
      %c0_53 = arith.constant 0 : index
      %35 = vector.load %arg3[%c0_49, %c0_50, %c2_51, %c0_52, %c0_53] : memref<1x1x18x18x4xf32, #tpu.memory_space<vmem>>, vector<1x1x16x16x4xf32>
      %36 = vector.shape_cast %35 : vector<1x1x16x16x4xf32> to vector<16x16x4xf32>
      %c0_54 = arith.constant 0 : index
      %c0_55 = arith.constant 0 : index
      %c24 = arith.constant 24 : index
      %37 = vector.load %arg7[%c0_54, %c0_55, %c24] : memref<16x16x36xf32, #tpu.memory_space<vmem>>, vector<16x16x4xf32>
      tpu.vector_store %arg7[%c0_54, %c0_55, %c24], %36 {strides = array<i32>} : memref<16x16x36xf32, #tpu.memory_space<vmem>>, vector<16x16x4xf32>,
      %c0_56 = arith.constant 0 : index
      %c0_57 = arith.constant 0 : index
      %c2_58 = arith.constant 2 : index
      %c1_59 = arith.constant 1 : index
      %c0_60 = arith.constant 0 : index
      %38 = vector.load %arg3[%c0_56, %c0_57, %c2_58, %c1_59, %c0_60] : memref<1x1x18x18x4xf32, #tpu.memory_space<vmem>>, vector<1x1x16x16x4xf32>
      %39 = vector.shape_cast %38 : vector<1x1x16x16x4xf32> to vector<16x16x4xf32>
      %c0_61 = arith.constant 0 : index
      %c0_62 = arith.constant 0 : index
      %c28 = arith.constant 28 : index
      %40 = vector.load %arg7[%c0_61, %c0_62, %c28] : memref<16x16x36xf32, #tpu.memory_space<vmem>>, vector<16x16x4xf32>
      tpu.vector_store %arg7[%c0_61, %c0_62, %c28], %39 {strides = array<i32>} : memref<16x16x36xf32, #tpu.memory_space<vmem>>, vector<16x16x4xf32>,
      %c0_63 = arith.constant 0 : index
      %c0_64 = arith.constant 0 : index
      %c2_65 = arith.constant 2 : index
      %c2_66 = arith.constant 2 : index
      %c0_67 = arith.constant 0 : index
      %41 = vector.load %arg3[%c0_63, %c0_64, %c2_65, %c2_66, %c0_67] : memref<1x1x18x18x4xf32, #tpu.memory_space<vmem>>, vector<1x1x16x16x4xf32>
      %42 = vector.shape_cast %41 : vector<1x1x16x16x4xf32> to vector<16x16x4xf32>
      %c0_68 = arith.constant 0 : index
      %c0_69 = arith.constant 0 : index
      %c32 = arith.constant 32 : index
      %43 = vector.load %arg7[%c0_68, %c0_69, %c32] : memref<16x16x36xf32, #tpu.memory_space<vmem>>, vector<16x16x4xf32>
      tpu.vector_store %arg7[%c0_68, %c0_69, %c32], %42 {strides = array<i32>} : memref<16x16x36xf32, #tpu.memory_space<vmem>>, vector<16x16x4xf32>,
    } else {
    }
    %c128_i32 = arith.constant 128 : i32
    %3 = arith.muli %arg2, %c128_i32 : i32
    %4 = tpu.assume_multiple %3, 128 : i32
    %c0 = arith.constant 0 : index
    %5 = arith.index_cast %4 : i32 to index
    %6 = vector.load %arg4[%c0, %5] : memref<36x128xf32, #tpu.memory_space<vmem>>, vector<36x128xf32>
    %c0_1 = arith.constant 0 : index
    %c0_2 = arith.constant 0 : index
    %c0_3 = arith.constant 0 : index
    %7 = vector.load %arg7[%c0_1, %c0_2, %c0_3] : memref<16x16x36xf32, #tpu.memory_space<vmem>>, vector<16x16x36xf32>
    %8 = vector.shape_cast %7 : vector<16x16x36xf32> to vector<256x36xf32>
    %cst = arith.constant dense<0.000000e+00> : vector<256x128xf32>
    %9 = tpu.matmul %8, %6, %cst {dimension_numbers = #tpu.dot_dimension_numbers<[1], [0], [0], [1], [0, 0, 1, 1], [], []>} : vector<256x36xf32>, vector<36x128xf32>, vector<256x128xf32> -> vector<256x128xf32>
    %c0_4 = arith.constant 0 : index
    %10 = arith.index_cast %4 : i32 to index
    %11 = vector.load %arg5[%c0_4, %10] : memref<1x128xf32, #tpu.memory_space<vmem>>, vector<1x128xf32>
    %12 = vector.broadcast %11 : vector<1x128xf32> to vector<256x128xf32>
    %13 = arith.addf %9, %12 : vector<256x128xf32>
    %c0_5 = arith.constant 0 : index
    %c0_6 = arith.constant 0 : index
    %c0_7 = arith.constant 0 : index
    %14 = vector.load %arg6[%c0_5, %c0_6, %c0_7] : memref<1x256x128xf32, #tpu.memory_space<vmem>>, vector<1x256x128xf32>
    %15 = vector.shape_cast %14 : vector<1x256x128xf32> to vector<256x128xf32>
    %16 = vector.shape_cast %13 : vector<256x128xf32> to vector<1x256x128xf32>
    tpu.vector_store %arg6[%c0_5, %c0_6, %c0_7], %16 {strides = array<i32>} : memref<1x256x128xf32, #tpu.memory_space<vmem>>, vector<1x256x128xf32>,
    return
  }
  func.func @transform_0(%arg0: i32, %arg1: i32, %arg2: i32) -> (i32, i32, i32, i32, i32) {
    %c0_i32 = arith.constant 0 : i32
    %c0_i32_0 = arith.constant 0 : i32
    %c0_i32_1 = arith.constant 0 : i32
    %c0_i32_2 = arith.constant 0 : i32
    return %arg0, %arg1, %c0_i32, %c0_i32_0, %c0_i32_1 : i32, i32, i32, i32, i32
  }
  func.func @transform_1(%arg0: i32, %arg1: i32, %arg2: i32) -> (i32, i32) {
    %c0_i32 = arith.constant 0 : i32
    %c0_i32_0 = arith.constant 0 : i32
    %c0_i32_1 = arith.constant 0 : i32
    return %c0_i32, %c0_i32_0 : i32, i32
  }
  func.func @transform_2(%arg0: i32, %arg1: i32, %arg2: i32) -> (i32, i32) {
    %c0_i32 = arith.constant 0 : i32
    %c0_i32_0 = arith.constant 0 : i32
    %c0_i32_1 = arith.constant 0 : i32
    return %c0_i32, %c0_i32_0 : i32, i32
  }
  func.func @transform_3(%arg0: i32, %arg1: i32, %arg2: i32) -> (i32, i32, i32) {
    %c0_i32 = arith.constant 0 : i32
    return %arg0, %arg1, %arg2 : i32, i32, i32
  }
}

</mosaic_0001>

<bundles_post_ra>
// kernel: default_conv2d.1
= control target key start
LH: loop header
LB: loop body
LE: loop exit
PB: predicated region body
PF: predicated region fallthrough
CT: control target
= control target key end

     0   :  { %s2781_s12 = smov 0   ;;  %s2783_s13 = smov 0   ;;  %s3908_s0 = inlined_call_operand.vmem [shape: f32[2,1,18,18,4], index: 0, kind: input, shape index: {}]   ;;  %s3909_s1 = inlined_call_operand.vmem [shape: f32[36,128], index: 1, kind: input, shape index: {}]   ;;  %s3910_s2 = inlined_call_operand.vmem [shape: f32[1,128], index: 2, kind: input, shape index: {}]   ;;  %s3911_s3 = inlined_call_operand.vmem [shape: f32[2,256,128], index: 3, kind: output, shape index: {}]  }
   0x1   :  { %s2785_s14 = smov 0  }
   0x2 LB: > { %s32_s15 = sadd.s32 1, %s2747_s13  ;;  %p2354_p0 = scmp.ge.s32.totalorder %s2751_s14, 1  ;;  %s2751_s14 = sphi %s2785_s14, %s13_s14   ;;  %s2747_s13 = sphi %s2783_s13, %s3927_s13   ;;  %s2743_s12 = sphi %s2781_s12, %s3926_s12  }
   0x3   : > { %p34_p1 = scmp.ge.s32.totalorder %s32_s15, 2  ;;  %p166_p2 = scmp.lt.s32.totalorder %s2751_s14, 3 }
   0x5   : > { %s3929_s15 = smov (%p34_p1, %s32_s15), 0  ;;  %p167_p3 = pnand %p2354_p0, %p166_p2 }
   0x7   : > { %170 = sbr.rel (%p167_p3) target bundleno = 869 (0x365), region = 32 }
   0xe   : > { %p201_p4 = scmp.lt.s32.totalorder %s2743_s12, 1  ;;  %s2753_s20 = smov 4   ;;  %vm259_vm0 = vcmask 31744   ;;  %vm452_vm1 = vcmask 64544   ;;  %vm645_vm2 = vcmask 97344   ;;  %vm1984_vm3 = vcmask 1043456  }
   0xf   : > { %s2754_s21 = smov 8   ;;  %s2755_s22 = smov 12   ;;  %vm839_vm4 = vcmask 130144   ;;  %vm1032_vm5 = vcmask 162944   ;;  %vm1225_vm6 = vcmask 195744   ;;  %vm1419_vm7 = vcmask 228544  }
  0x10   : > { %s3931_s12 = smov (!%p201_p4, %s2743_s12), 1  ;;  %s2756_s23 = smov 16   ;;  %vm1612_vm8 = vcmask 261344   ;;  %vm1805_vm9 = vcmask 294144   ;;  %vm1887_vm10 = vcmask 293888  }
  0x11   : > { %s2696_s16 = smul.u32 432, %s3931_s12  ;;  %s2757_s24 = smov 20  }
  0x12   : > { %s2758_s25 = smov 24   ;;  %s2759_s26 = smov 28  }
  0x13   : > { %s2805_s19 = scalar_lea.vmem %s3908_s0, %s2696_s16  ;;  %s2760_s8 = smov 32  }
  0x14   : > { %v2808_v0 = vld [vmem:[%s2805_s19 + $0x19] sm:$0xff]  ;;  %v292_v1 = vld [vmem:[%s2805_s19 + $0x1] sm:$0xff]  ;;  %v293_v3 = vld [vmem:[%s2805_s19 + $0x9] sm:$0xff]  ;;  %s2586_s11 = sshll.u32 %s3931_s12, 8 }
  0x15   : > { %360 = vrot.lane.b32.xlu1 %v2808_v0, %s2753_s20  ;;  %356 = vrot.lane.b32.xlu0 %v292_v1, %s2753_s20  ;;  %v2815_v2 = vld [vmem:[%s2805_s19 + $0x21] sm:$0xff]  ;;  %v2822_v4 = vld [vmem:[%s2805_s19 + $0x39] sm:$0xff] }
  0x16   : > { %v2825_v5 = vld [vmem:[%s2805_s19 + $0x31] sm:$0xff]  ;;  %v2835_v7 = vld [vmem:[%s2805_s19 + $0x49] sm:$0xff]  ;;  %v300_v9 = vld [vmem:[%s2805_s19 + $0x61] sm:$0xff] }
  0x17   : > { %v2832_v6 = vld [vmem:[%s2805_s19 + $0x51] sm:$0xff]  ;;  %v301_v8 = vld [vmem:[%s2805_s19 + $0x69] sm:$0xff]  ;;  %v303_v10 = vld [vmem:[%s2805_s19 + $0x81] sm:$0xff] }
  0x18   : > { %v302_v11 = vld [vmem:[%s2805_s19 + $0x79] sm:$0xff]  ;;  %v304_v15 = vld [vmem:[%s2805_s19 + $0x91] sm:$0xff]  ;;  %v228_v17 = vld [vmem:[%s2805_s19 + $0x8] sm:$0xff] }
  0x19   : > { %362 = vrot.lane.b32.xlu1 %v2815_v2, %s2753_s20  ;;  %358 = vrot.lane.b32.xlu0 %v293_v3, %s2753_s20  ;;  %v2850_v12 = vld [vmem:[%s2805_s19 + $0x18] sm:$0xff]  ;;  %v227_v13 = vld [vmem:[%s2805_s19] sm:$0xff]  ;;  %261 = vst.msk [vmem:[#allocation2 + $0x8] sm:$0xff] %vm259_vm0, %v228_v17 }
  0x1a   : > { %v305_v14 = vld [vmem:[%s2805_s19 + $0x99] sm:$0xff]  ;;  %262 = vst.msk [vmem:[#allocation2 + $0x10] sm:$0xff] %vm259_vm0, %v2850_v12  ;;  %260 = vst.msk [vmem:[#allocation2] sm:$0xff] %vm259_vm0, %v227_v13  ;;  %v307_v18 = vld [vmem:[%s2805_s19 + $0xb1] sm:$0xff] }
  0x1b   : > { %v2859_v16 = vld [vmem:[%s2805_s19 + $0x20] sm:$0xff]  ;;  %v2867_v19 = vld [vmem:[%s2805_s19 + $0x38] sm:$0xff]  ;;  %v2870_v20 = vld [vmem:[%s2805_s19 + $0x30] sm:$0xff] }
  0x1c   : > { %263 = vst.msk [vmem:[#allocation2 + $0x18] sm:$0xff] %vm259_vm0, %v2859_v16  ;;  %v306_v21 = vld [vmem:[%s2805_s19 + $0xa9] sm:$0xff]  ;;  %265 = vst.msk [vmem:[#allocation2 + $0x28] sm:$0xff] %vm259_vm0, %v2867_v19  ;;  %v2891_v25 = vld [vmem:[%s2805_s19 + $0x60] sm:$0xff] }
  0x1d   : > { %366 = vrot.lane.b32.xlu1 %v2822_v4, %s2753_s20  ;;  %364 = vrot.lane.b32.xlu0 %v2825_v5, %s2753_s20  ;;  %264 = vst.msk [vmem:[#allocation2 + $0x20] sm:$0xff] %vm259_vm0, %v2870_v20  ;;  %v2880_v22 = vld [vmem:[%s2805_s19 + $0x50] sm:$0xff]  ;;  %v2885_v23 = vld [vmem:[%s2805_s19 + $0x48] sm:$0xff]  ;;  %268 = vst.msk [vmem:[#allocation2 + $0x40] sm:$0xff] %vm259_vm0, %v2891_v25 }
  0x1e   : > { %267 = vst.msk [vmem:[#allocation2 + $0x38] sm:$0xff] %vm259_vm0, %v2880_v22  ;;  %v2888_v24 = vld [vmem:[%s2805_s19 + $0x68] sm:$0xff]  ;;  %266 = vst.msk [vmem:[#allocation2 + $0x30] sm:$0xff] %vm259_vm0, %v2885_v23  ;;  %v2900_v26 = vld [vmem:[%s2805_s19 + $0x80] sm:$0xff] }
  0x1f   : > { %269 = vst.msk [vmem:[#allocation2 + $0x48] sm:$0xff] %vm259_vm0, %v2888_v24  ;;  %v2903_v27 = vld [vmem:[%s2805_s19 + $0x78] sm:$0xff]  ;;  %v309_v29 = vld [vmem:[%s2805_s19 + $0xc9] sm:$0xff]  ;;  %v308_v30 = vld [vmem:[%s2805_s19 + $0xc1] sm:$0xff] }
  0x20   : > { %v2906_v28 = vld [vmem:[%s2805_s19 + $0x98] sm:$0xff]  ;;  %271 = vst.msk [vmem:[#allocation2 + $0x58] sm:$0xff] %vm259_vm0, %v2900_v26  ;;  %270 = vst.msk [vmem:[#allocation2 + $0x50] sm:$0xff] %vm259_vm0, %v2903_v27  ;;  %v2917_v31 = vld [vmem:[%s2805_s19 + $0x90] sm:$0xff] }
  0x21   : > { %370 = vrot.lane.b32.xlu1 %v2832_v6, %s2753_s20  ;;  %368 = vrot.lane.b32.xlu0 %v2835_v7, %s2753_s20  ;;  %273 = vst.msk [vmem:[#allocation2 + $0x68] sm:$0xff] %vm259_vm0, %v2906_v28  ;;  %v2920_v32 = vld [vmem:[%s2805_s19 + $0xb0] sm:$0xff]  ;;  %v2923_v33 = vld [vmem:[%s2805_s19 + $0xa8] sm:$0xff]  ;;  %272 = vst.msk [vmem:[#allocation2 + $0x60] sm:$0xff] %vm259_vm0, %v2917_v31 }
  0x22   : > { %275 = vst.msk [vmem:[#allocation2 + $0x78] sm:$0xff] %vm259_vm0, %v2920_v32  ;;  %274 = vst.msk [vmem:[#allocation2 + $0x70] sm:$0xff] %vm259_vm0, %v2923_v33  ;;  %v2934_v34 = vld [vmem:[%s2805_s19 + $0xc8] sm:$0xff]  ;;  %v2937_v35 = vld [vmem:[%s2805_s19 + $0xc0] sm:$0xff] }
  0x23   : > { %277 = vst.msk [vmem:[#allocation2 + $0x88] sm:$0xff] %vm259_vm0, %v2934_v34  ;;  %276 = vst.msk [vmem:[#allocation2 + $0x80] sm:$0xff] %vm259_vm0, %v2937_v35  ;;  %v2944_v36 = vld [vmem:[%s2805_s19 + $0xe0] sm:$0xff]  ;;  %v2947_v37 = vld [vmem:[%s2805_s19 + $0xd8] sm:$0xff] }
  0x24   : > { %v2950_v38 = vld [vmem:[%s2805_s19 + $0xf8] sm:$0xff]  ;;  %279 = vst.msk [vmem:[#allocation2 + $0x98] sm:$0xff] %vm259_vm0, %v2944_v36  ;;  %278 = vst.msk [vmem:[#allocation2 + $0x90] sm:$0xff] %vm259_vm0, %v2947_v37  ;;  %v2959_v39 = vld [vmem:[%s2805_s19 + $0xf0] sm:$0xff] }
  0x25   : > { %374 = vrot.lane.b32.xlu1 %v301_v8, %s2753_s20  ;;  %372 = vrot.lane.b32.xlu0 %v300_v9, %s2753_s20  ;;  %281 = vst.msk [vmem:[#allocation2 + $0xa8] sm:$0xff] %vm259_vm0, %v2950_v38  ;;  %v2962_v40 = vld [vmem:[%s2805_s19 + $0x110] sm:$0xff]  ;;  %v2965_v41 = vld [vmem:[%s2805_s19 + $0x108] sm:$0xff]  ;;  %280 = vst.msk [vmem:[#allocation2 + $0xa0] sm:$0xff] %vm259_vm0, %v2959_v39 }
  0x26   : > { %283 = vst.msk [vmem:[#allocation2 + $0xb8] sm:$0xff] %vm259_vm0, %v2962_v40  ;;  %282 = vst.msk [vmem:[#allocation2 + $0xb0] sm:$0xff] %vm259_vm0, %v2965_v41  ;;  %v2976_v42 = vld [vmem:[%s2805_s19 + $0xe1] sm:$0xff]  ;;  %v2979_v43 = vld [vmem:[%s2805_s19 + $0xd9] sm:$0xff] }
  0x27   : > { %v2982_v44 = vld [vmem:[%s2805_s19 + $0x128] sm:$0xff]  ;;  %v2985_v45 = vld [vmem:[%s2805_s19 + $0x120] sm:$0xff]  ;;  %v2999_v47 = vld [vmem:[%s2805_s19 + $0xf1] sm:$0xff] }
  0x28   : > { %285 = vst.msk [vmem:[#allocation2 + $0xc8] sm:$0xff] %vm259_vm0, %v2982_v44  ;;  %284 = vst.msk [vmem:[#allocation2 + $0xc0] sm:$0xff] %vm259_vm0, %v2985_v45  ;;  %v2996_v46 = vld [vmem:[%s2805_s19 + $0xf9] sm:$0xff]  ;;  %v3016_v50 = vld [vmem:[%s2805_s19 + $0x111] sm:$0xff] }
  0x29   : > { %378 = vrot.lane.b32.xlu1 %v303_v10, %s2753_s20  ;;  %376 = vrot.lane.b32.xlu0 %v302_v11, %s2753_s20  ;;  %v3002_v48 = vld [vmem:[%s2805_s19 + $0x140] sm:$0xff]  ;;  %v3005_v49 = vld [vmem:[%s2805_s19 + $0x138] sm:$0xff] }
  0x2a   : > { %287 = vst.msk [vmem:[#allocation2 + $0xd8] sm:$0xff] %vm259_vm0, %v3002_v48  ;;  %286 = vst.msk [vmem:[#allocation2 + $0xd0] sm:$0xff] %vm259_vm0, %v3005_v49  ;;  %v3019_v51 = vld [vmem:[%s2805_s19 + $0x109] sm:$0xff]  ;;  %v3022_v52 = vld [vmem:[%s2805_s19 + $0x158] sm:$0xff] }
  0x2b   : > { %v3025_v53 = vld [vmem:[%s2805_s19 + $0x150] sm:$0xff]  ;;  %289 = vst.msk [vmem:[#allocation2 + $0xe8] sm:$0xff] %vm259_vm0, %v3022_v52  ;;  %v3037_v55 = vld [vmem:[%s2805_s19 + $0x121] sm:$0xff]  ;;  %v318_v59 = vld [vmem:[%s2805_s19 + $0x139] sm:$0xff] }
  0x2c   : > { %288 = vst.msk [vmem:[#allocation2 + $0xe0] sm:$0xff] %vm259_vm0, %v3025_v53  ;;  %v317_v54 = vld [vmem:[%s2805_s19 + $0x129] sm:$0xff]  ;;  %3918 = vst [vmem:[#allocation3_spill] sm:$0xff] %v3037_v55  ;;  %v319_v58 = vld [vmem:[%s2805_s19 + $0x141] sm:$0xff] }
  0x2d   : > { %382 = vrot.lane.b32.xlu1 %v305_v14, %s2753_s20  ;;  %380 = vrot.lane.b32.xlu0 %v304_v15, %s2753_s20  ;;  %v3040_v56 = vld [vmem:[%s2805_s19 + $0x170] sm:$0xff]  ;;  %v3043_v57 = vld [vmem:[%s2805_s19 + $0x168] sm:$0xff] }
  0x2e   : > { %291 = vst.msk [vmem:[#allocation2 + $0xf8] sm:$0xff] %vm259_vm0, %v3040_v56  ;;  %290 = vst.msk [vmem:[#allocation2 + $0xf0] sm:$0xff] %vm259_vm0, %v3043_v57  ;;  %v321_v60 = vld [vmem:[%s2805_s19 + $0x159] sm:$0xff]  ;;  %v320_v61 = vld [vmem:[%s2805_s19 + $0x151] sm:$0xff] }
  0x2f   : > { %v323_v62 = vld [vmem:[%s2805_s19 + $0x171] sm:$0xff]  ;;  %v322_v63 = vld [vmem:[%s2805_s19 + $0x169] sm:$0xff]  ;;  %v3072_v9 = vld [vmem:[%s2805_s19 + $0x1a] sm:$0xff] }
  0x30   : > { %v486_v1 = vld [vmem:[%s2805_s19 + $0xa] sm:$0xff]  ;;  %v485_v3 = vld [vmem:[%s2805_s19 + $0x2] sm:$0xff]  ;;  %v3079_v10 = vld [vmem:[%s2805_s19 + $0x3a] sm:$0xff] }
  0x31   : > { %386 = vrot.lane.b32.xlu1 %v307_v18, %s2753_s20  ;;  %384 = vrot.lane.b32.xlu0 %v306_v21, %s2753_s20  ;;  %v3069_v8 = vld [vmem:[%s2805_s19 + $0x22] sm:$0xff]  ;;  %v3082_v11 = vld [vmem:[%s2805_s19 + $0x32] sm:$0xff] }
  0x32   : > { %v3089_v13 = vld [vmem:[%s2805_s19 + $0x52] sm:$0xff]  ;;  %v3092_v14 = vld [vmem:[%s2805_s19 + $0x4a] sm:$0xff]  ;;  %v3100_v17 = vld [vmem:[%s2805_s19 + $0x62] sm:$0xff] }
  0x33   : > { %v494_v15 = vld [vmem:[%s2805_s19 + $0x6a] sm:$0xff]  ;;  %3919 = vst [vmem:[#allocation4_spill] sm:$0xff] %v3100_v17  ;;  %v496_v18 = vld [vmem:[%s2805_s19 + $0x82] sm:$0xff]  ;;  %v495_v21 = vld [vmem:[%s2805_s19 + $0x7a] sm:$0xff] }
  0x35   : > { %390 = vrot.lane.b32.xlu1 %v309_v29, %s2753_s20  ;;  %388 = vrot.lane.b32.xlu0 %v308_v30, %s2753_s20  ;;  %v498_v29 = vld [vmem:[%s2805_s19 + $0x9a] sm:$0xff]  ;;  %v497_v30 = vld [vmem:[%s2805_s19 + $0x92] sm:$0xff] }
  0x39   : > { %394 = vrot.lane.b32.xlu1 %v2976_v42, %s2753_s20  ;;  %392 = vrot.lane.b32.xlu0 %v2979_v43, %s2753_s20 }
  0x3d   : > { %398 = vrot.lane.b32.xlu1 %v2996_v46, %s2753_s20  ;;  %396 = vrot.lane.b32.xlu0 %v2999_v47, %s2753_s20 }
  0x41   : > { %402 = vrot.lane.b32.xlu1 %v3016_v50, %s2753_s20  ;;  %400 = vrot.lane.b32.xlu0 %v3019_v51, %s2753_s20 }
  0x45   : > { %406 = vrot.lane.b32.xlu1 %v317_v54, %s2753_s20  ;;  %404 = vrot.lane.b32.xlu0 %v3037_v55, %s2753_s20  ;;  %v500_v54 = vld [vmem:[%s2805_s19 + $0xb2] sm:$0xff] }
  0x49   : > { %410 = vrot.lane.b32.xlu1 %v319_v58, %s2753_s20  ;;  %408 = vrot.lane.b32.xlu0 %v318_v59, %s2753_s20  ;;  %v499_v58 = vld [vmem:[%s2805_s19 + $0xaa] sm:$0xff] }
  0x4a   : > { %v502_v59 = vld [vmem:[%s2805_s19 + $0xca] sm:$0xff] }
  0x4d   : > { %414 = vrot.lane.b32.xlu1 %v321_v60, %s2753_s20  ;;  %412 = vrot.lane.b32.xlu0 %v320_v61, %s2753_s20  ;;  %v501_v60 = vld [vmem:[%s2805_s19 + $0xc2] sm:$0xff] }
  0x4e   : > { %v3122_v61 = vld [vmem:[%s2805_s19 + $0xe2] sm:$0xff] }
  0x51   : > { %418 = vrot.lane.b32.xlu1 %v323_v62, %s2753_s20  ;;  %416 = vrot.lane.b32.xlu0 %v322_v63, %s2753_s20  ;;  %v3125_v62 = vld [vmem:[%s2805_s19 + $0xda] sm:$0xff]  ;;  %s3801_s20 = scalar_lea.vmem %s3911_s3, %s2586_s11 }
  0x52   : > { %v3132_v63 = vld [vmem:[%s2805_s19 + $0xfa] sm:$0xff] }
  0x55   : > { %551 = vrot.lane.b32.xlu1 %v486_v1, %s2754_s21  ;;  %549 = vrot.lane.b32.xlu0 %v485_v3, %s2754_s21  ;;  %v3135_v1 = vld [vmem:[%s2805_s19 + $0xf2] sm:$0xff] }
  0x56   : > { %v3142_v3 = vld [vmem:[%s2805_s19 + $0x112] sm:$0xff] }
  0x59   : > { %555 = vrot.lane.b32.xlu1 %v3069_v8, %s2754_s21  ;;  %553 = vrot.lane.b32.xlu0 %v3072_v9, %s2754_s21 }
  0x5d   : > { %559 = vrot.lane.b32.xlu1 %v3079_v10, %s2754_s21  ;;  %557 = vrot.lane.b32.xlu0 %v3082_v11, %s2754_s21 }
  0x61   : > { %563 = vrot.lane.b32.xlu1 %v3089_v13, %s2754_s21  ;;  %561 = vrot.lane.b32.xlu0 %v3092_v14, %s2754_s21 }
  0x65   : > { %567 = vrot.lane.b32.xlu1 %v494_v15, %s2754_s21  ;;  %565 = vrot.lane.b32.xlu0 %v3100_v17, %s2754_s21  ;;  %v3145_v15 = vld [vmem:[%s2805_s19 + $0x10a] sm:$0xff] }
  0x69   : > { %571 = vrot.lane.b32.xlu1 %v496_v18, %s2754_s21  ;;  %569 = vrot.lane.b32.xlu0 %v495_v21, %s2754_s21  ;;  %v3152_v18 = vld [vmem:[%s2805_s19 + $0x12a] sm:$0xff]  ;;  %v3155_v21 = vld [vmem:[%s2805_s19 + $0x122] sm:$0xff] }
  0x6a   : > { %3920 = vst [vmem:[#allocation5_spill] sm:$0xff] %v3152_v18  ;;  %3921 = vst [vmem:[#allocation6_spill] sm:$0xff] %v3155_v21 }
  0x6d   : > { %575 = vrot.lane.b32.xlu1 %v498_v29, %s2754_s21  ;;  %573 = vrot.lane.b32.xlu0 %v497_v30, %s2754_s21  ;;  %v512_v29 = vld [vmem:[%s2805_s19 + $0x142] sm:$0xff]  ;;  %v511_v30 = vld [vmem:[%s2805_s19 + $0x13a] sm:$0xff] }
  0x71   : > { %579 = vrot.lane.b32.xlu1 %v500_v54, %s2754_s21  ;;  %577 = vrot.lane.b32.xlu0 %v499_v58, %s2754_s21 }
  0x75   : > { %583 = vrot.lane.b32.xlu1 %v502_v59, %s2754_s21  ;;  %581 = vrot.lane.b32.xlu0 %v501_v60, %s2754_s21  ;;  %v514_v59 = vld [vmem:[%s2805_s19 + $0x15a] sm:$0xff]  ;;  %v513_v60 = vld [vmem:[%s2805_s19 + $0x152] sm:$0xff] }
  0x79   : > { %587 = vrot.lane.b32.xlu1 %v3122_v61, %s2754_s21  ;;  %585 = vrot.lane.b32.xlu0 %v3125_v62, %s2754_s21 }
  0x7d   : > { %591 = vrot.lane.b32.xlu1 %v3132_v63, %s2754_s21  ;;  %589 = vrot.lane.b32.xlu0 %v3135_v1, %s2754_s21 }
  0x81   : > { %595 = vrot.lane.b32.xlu1 %v3142_v3, %s2754_s21  ;;  %593 = vrot.lane.b32.xlu0 %v3145_v15, %s2754_s21 }
  0x85   : > { %599 = vrot.lane.b32.xlu1 %v3152_v18, %s2754_s21  ;;  %597 = vrot.lane.b32.xlu0 %v3155_v21, %s2754_s21  ;;  %v516_v21 = vld [vmem:[%s2805_s19 + $0x172] sm:$0xff] }
  0x87   : > { %v361_v54 = vpop.permute.xlu1 %360  ;;  %v357_v58 = vpop.permute.xlu0 %356 }
  0x88   : > { %455 = vst.msk [vmem:[#allocation2 + $0x10] sm:$0xff] %vm452_vm1, %v361_v54  ;;  %453 = vst.msk [vmem:[#allocation2] sm:$0xff] %vm452_vm1, %v357_v58  ;;  %v515_v54 = vld [vmem:[%s2805_s19 + $0x16a] sm:$0xff] }
  0x89   : > { %603 = vrot.lane.b32.xlu1 %v512_v29, %s2754_s21  ;;  %601 = vrot.lane.b32.xlu0 %v511_v30, %s2754_s21 }
  0x8b   : > { %v363_v18 = vpop.permute.xlu1 %362  ;;  %v359_v17 = vpop.permute.xlu0 %358 }
  0x8c   : > { %456 = vst.msk [vmem:[#allocation2 + $0x18] sm:$0xff] %vm452_vm1, %v363_v18  ;;  %454 = vst.msk [vmem:[#allocation2 + $0x8] sm:$0xff] %vm452_vm1, %v359_v17 }
  0x8d   : > { %607 = vrot.lane.b32.xlu1 %v514_v59, %s2754_s21  ;;  %605 = vrot.lane.b32.xlu0 %v513_v60, %s2754_s21 }
  0x8f   : > { %v367_v55 = vpop.permute.xlu1 %366  ;;  %v365_v58 = vpop.permute.xlu0 %364 }
  0x90   : > { %458 = vst.msk [vmem:[#allocation2 + $0x28] sm:$0xff] %vm452_vm1, %v367_v55  ;;  %457 = vst.msk [vmem:[#allocation2 + $0x20] sm:$0xff] %vm452_vm1, %v365_v58 }
  0x91   : > { %611 = vrot.lane.b32.xlu1 %v516_v21, %s2754_s21  ;;  %609 = vrot.lane.b32.xlu0 %v515_v54, %s2754_s21 }
  0x93   : > { %v371_v29 = vpop.permute.xlu1 %370  ;;  %v369_v18 = vpop.permute.xlu0 %368 }
  0x94   : > { %460 = vst.msk [vmem:[#allocation2 + $0x38] sm:$0xff] %vm452_vm1, %v371_v29  ;;  %459 = vst.msk [vmem:[#allocation2 + $0x30] sm:$0xff] %vm452_vm1, %v369_v18 }
  0x95   : > { %745 = vrot.lane.b32.xlu1 %v2859_v16, %s2755_s22  ;;  %743 = vrot.lane.b32.xlu0 %v2850_v12, %s2755_s22 }
  0x97   : > { %v375_v55 = vpop.permute.xlu1 %374  ;;  %v373_v17 = vpop.permute.xlu0 %372 }
  0x98   : > { %462 = vst.msk [vmem:[#allocation2 + $0x48] sm:$0xff] %vm452_vm1, %v375_v55  ;;  %461 = vst.msk [vmem:[#allocation2 + $0x40] sm:$0xff] %vm452_vm1, %v373_v17 }
  0x99   : > { %749 = vrot.lane.b32.xlu1 %v2867_v19, %s2755_s22  ;;  %747 = vrot.lane.b32.xlu0 %v2870_v20, %s2755_s22 }
  0x9b   : > { %v379_v21 = vpop.permute.xlu1 %378  ;;  %v377_v30 = vpop.permute.xlu0 %376 }
  0x9c   : > { %464 = vst.msk [vmem:[#allocation2 + $0x58] sm:$0xff] %vm452_vm1, %v379_v21  ;;  %463 = vst.msk [vmem:[#allocation2 + $0x50] sm:$0xff] %vm452_vm1, %v377_v30 }
  0x9d   : > { %753 = vrot.lane.b32.xlu1 %v2880_v22, %s2755_s22  ;;  %751 = vrot.lane.b32.xlu0 %v2885_v23, %s2755_s22 }
  0x9f   : > { %v383_v12 = vpop.permute.xlu1 %382  ;;  %v381_v16 = vpop.permute.xlu0 %380 }
  0xa0   : > { %466 = vst.msk [vmem:[#allocation2 + $0x68] sm:$0xff] %vm452_vm1, %v383_v12  ;;  %465 = vst.msk [vmem:[#allocation2 + $0x60] sm:$0xff] %vm452_vm1, %v381_v16 }
  0xa1   : > { %757 = vrot.lane.b32.xlu1 %v2888_v24, %s2755_s22  ;;  %755 = vrot.lane.b32.xlu0 %v2891_v25, %s2755_s22 }
  0xa3   : > { %v387_v59 = vpop.permute.xlu1 %386  ;;  %v385_v60 = vpop.permute.xlu0 %384 }
  0xa4   : > { %468 = vst.msk [vmem:[#allocation2 + $0x78] sm:$0xff] %vm452_vm1, %v387_v59  ;;  %467 = vst.msk [vmem:[#allocation2 + $0x70] sm:$0xff] %vm452_vm1, %v385_v60 }
  0xa5   : > { %761 = vrot.lane.b32.xlu1 %v2900_v26, %s2755_s22  ;;  %759 = vrot.lane.b32.xlu0 %v2903_v27, %s2755_s22 }
  0xa7   : > { %v391_v54 = vpop.permute.xlu1 %390  ;;  %v389_v58 = vpop.permute.xlu0 %388 }
  0xa8   : > { %470 = vst.msk [vmem:[#allocation2 + $0x88] sm:$0xff] %vm452_vm1, %v391_v54  ;;  %469 = vst.msk [vmem:[#allocation2 + $0x80] sm:$0xff] %vm452_vm1, %v389_v58  ;;  %v2389_v54 = vld [vmem:[%s2805_s19 + $0x188] sm:$0xff]  ;;  %v2388_v58 = vld [vmem:[%s2805_s19 + $0x180] sm:$0xff] }
  0xa9   : > { %765 = vrot.lane.b32.xlu1 %v2906_v28, %s2755_s22  ;;  %763 = vrot.lane.b32.xlu0 %v2917_v31, %s2755_s22 }
  0xab   : > { %v395_v29 = vpop.permute.xlu1 %394  ;;  %v393_v18 = vpop.permute.xlu0 %392 }
  0xac   : > { %472 = vst.msk [vmem:[#allocation2 + $0x98] sm:$0xff] %vm452_vm1, %v395_v29  ;;  %471 = vst.msk [vmem:[#allocation2 + $0x90] sm:$0xff] %vm452_vm1, %v393_v18 }
  0xad   : > { %769 = vrot.lane.b32.xlu1 %v2920_v32, %s2755_s22  ;;  %767 = vrot.lane.b32.xlu0 %v2923_v33, %s2755_s22 }
  0xaf   : > { %v399_v55 = vpop.permute.xlu1 %398  ;;  %v397_v17 = vpop.permute.xlu0 %396 }
  0xb0   : > { %474 = vst.msk [vmem:[#allocation2 + $0xa8] sm:$0xff] %vm452_vm1, %v399_v55  ;;  %473 = vst.msk [vmem:[#allocation2 + $0xa0] sm:$0xff] %vm452_vm1, %v397_v17 }
  0xb1   : > { %773 = vrot.lane.b32.xlu1 %v2934_v34, %s2755_s22  ;;  %771 = vrot.lane.b32.xlu0 %v2937_v35, %s2755_s22 }
  0xb3   : > { %v403_v28 = vpop.permute.xlu1 %402  ;;  %v401_v31 = vpop.permute.xlu0 %400 }
  0xb4   : > { %476 = vst.msk [vmem:[#allocation2 + $0xb8] sm:$0xff] %vm452_vm1, %v403_v28  ;;  %475 = vst.msk [vmem:[#allocation2 + $0xb0] sm:$0xff] %vm452_vm1, %v401_v31 }
  0xb5   : > { %777 = vrot.lane.b32.xlu1 %v2944_v36, %s2755_s22  ;;  %775 = vrot.lane.b32.xlu0 %v2947_v37, %s2755_s22 }
  0xb7   : > { %v407_v32 = vpop.permute.xlu1 %406  ;;  %v405_v33 = vpop.permute.xlu0 %404 }
  0xb8   : > { %478 = vst.msk [vmem:[#allocation2 + $0xc8] sm:$0xff] %vm452_vm1, %v407_v32  ;;  %477 = vst.msk [vmem:[#allocation2 + $0xc0] sm:$0xff] %vm452_vm1, %v405_v33 }
  0xb9   : > { %781 = vrot.lane.b32.xlu1 %v2950_v38, %s2755_s22  ;;  %779 = vrot.lane.b32.xlu0 %v2959_v39, %s2755_s22 }
  0xbb   : > { %v411_v34 = vpop.permute.xlu1 %410  ;;  %v409_v35 = vpop.permute.xlu0 %408 }
  0xbc   : > { %480 = vst.msk [vmem:[#allocation2 + $0xd8] sm:$0xff] %vm452_vm1, %v411_v34  ;;  %479 = vst.msk [vmem:[#allocation2 + $0xd0] sm:$0xff] %vm452_vm1, %v409_v35  ;;  %v1844_v35 = vld [vmem:[%s3909_s1 + $0x10] sm:$0xff] }
  0xbd   : > { %785 = vrot.lane.b32.xlu1 %v2962_v40, %s2755_s22  ;;  %783 = vrot.lane.b32.xlu0 %v2965_v41, %s2755_s22 }
  0xbf   : > { %v415_v36 = vpop.permute.xlu1 %414  ;;  %v413_v37 = vpop.permute.xlu0 %412 }
  0xc0   : > { %482 = vst.msk [vmem:[#allocation2 + $0xe8] sm:$0xff] %vm452_vm1, %v415_v36  ;;  %481 = vst.msk [vmem:[#allocation2 + $0xe0] sm:$0xff] %vm452_vm1, %v413_v37  ;;  %v1845_v36 = vld [vmem:[%s3909_s1 + $0x18] sm:$0xff] }
  0xc1   : > { %789 = vrot.lane.b32.xlu1 %v2982_v44, %s2755_s22  ;;  %787 = vrot.lane.b32.xlu0 %v2985_v45, %s2755_s22  ;;  %v2686_v37 = vpack.c.bf16 %v1845_v36, %v1844_v35  ;;  %v3925_v36 = vld [vmem:[#allocation5_spill] sm:$0xff] }
  0xc3   : > { %v419_v21 = vpop.permute.xlu1 %418  ;;  %v417_v30 = vpop.permute.xlu0 %416 }
  0xc4   : > { %484 = vst.msk [vmem:[#allocation2 + $0xf8] sm:$0xff] %vm452_vm1, %v419_v21  ;;  %483 = vst.msk [vmem:[#allocation2 + $0xf0] sm:$0xff] %vm452_vm1, %v417_v30 }
  0xc5   : > { %793 = vrot.lane.b32.xlu1 %v3002_v48, %s2755_s22  ;;  %791 = vrot.lane.b32.xlu0 %v3005_v49, %s2755_s22 }
  0xc7   : > { %v552_v12 = vpop.permute.xlu1 %551  ;;  %v550_v16 = vpop.permute.xlu0 %549 }
  0xc8   : > { %647 = vst.msk [vmem:[#allocation2 + $0x8] sm:$0xff] %vm645_vm2, %v552_v12  ;;  %646 = vst.msk [vmem:[#allocation2] sm:$0xff] %vm645_vm2, %v550_v16  ;;  %v1846_v12 = vld [vmem:[%s3909_s1 + $0x20] sm:$0xf] }
  0xc9   : > { %797 = vrot.lane.b32.xlu1 %v3022_v52, %s2755_s22  ;;  %795 = vrot.lane.b32.xlu0 %v3025_v53, %s2755_s22 }
  0xcb   : > { %v556_v59 = vpop.permute.xlu1 %555  ;;  %v554_v60 = vpop.permute.xlu0 %553 }
  0xcc   : > { %649 = vst.msk [vmem:[#allocation2 + $0x18] sm:$0xff] %vm645_vm2, %v556_v59  ;;  %648 = vst.msk [vmem:[#allocation2 + $0x10] sm:$0xff] %vm645_vm2, %v554_v60 }
  0xcd   : > { %801 = vrot.lane.b32.xlu1 %v3040_v56, %s2755_s22  ;;  %799 = vrot.lane.b32.xlu0 %v3043_v57, %s2755_s22 }
  0xcf   : > { %v560_v29 = vpop.permute.xlu1 %559  ;;  %v558_v18 = vpop.permute.xlu0 %557 }
  0xd0   : > { %651 = vst.msk [vmem:[#allocation2 + $0x28] sm:$0xff] %vm645_vm2, %v560_v29  ;;  %650 = vst.msk [vmem:[#allocation2 + $0x20] sm:$0xff] %vm645_vm2, %v558_v18 }
  0xd1   : > { %805 = vrot.lane.b32.xlu1 %v2389_v54, %s2755_s22  ;;  %803 = vrot.lane.b32.xlu0 %v2388_v58, %s2755_s22 }
  0xd3   : > { %v564_v55 = vpop.permute.xlu1 %563  ;;  %v562_v17 = vpop.permute.xlu0 %561 }
  0xd4   : > { %653 = vst.msk [vmem:[#allocation2 + $0x38] sm:$0xff] %vm645_vm2, %v564_v55  ;;  %652 = vst.msk [vmem:[#allocation2 + $0x30] sm:$0xff] %vm645_vm2, %v562_v17 }
  0xd5   : > { %938 = vrot.lane.b32.xlu1 %v2815_v2, %s2756_s23  ;;  %936 = vrot.lane.b32.xlu0 %v2808_v0, %s2756_s23 }
  0xd7   : > { %v568_v56 = vpop.permute.xlu1 %567  ;;  %v566_v57 = vpop.permute.xlu0 %565 }
  0xd8   : > { %655 = vst.msk [vmem:[#allocation2 + $0x48] sm:$0xff] %vm645_vm2, %v568_v56  ;;  %654 = vst.msk [vmem:[#allocation2 + $0x40] sm:$0xff] %vm645_vm2, %v566_v57 }
  0xd9   : > { %968 = vrot.lane.b32.xlu1 %v2979_v43, %s2756_s23  ;;  %940 = vrot.lane.b32.xlu0 %v2825_v5, %s2756_s23 }
  0xdb   : > { %v572_v28 = vpop.permute.xlu1 %571  ;;  %v570_v31 = vpop.permute.xlu0 %569 }
  0xdc   : > { %657 = vst.msk [vmem:[#allocation2 + $0x58] sm:$0xff] %vm645_vm2, %v572_v28  ;;  %656 = vst.msk [vmem:[#allocation2 + $0x50] sm:$0xff] %vm645_vm2, %v570_v31 }
  0xdd   : > { %1129 = vrot.lane.b32.xlu1 %v3072_v9, %s2757_s24  ;;  %970 = vrot.lane.b32.xlu0 %v2976_v42, %s2756_s23 }
  0xdf   : > { %v576_v0 = vpop.permute.xlu1 %575  ;;  %v574_v2 = vpop.permute.xlu0 %573 }
  0xe0   : > { %659 = vst.msk [vmem:[#allocation2 + $0x68] sm:$0xff] %vm645_vm2, %v576_v0  ;;  %658 = vst.msk [vmem:[#allocation2 + $0x60] sm:$0xff] %vm645_vm2, %v574_v2  ;;  %v2412_v2 = vld [vmem:[%s2805_s19 + $0x121] sm:$0xff] }
  0xe1   : > { %1131 = vrot.lane.b32.xlu1 %v3069_v8, %s2757_s24  ;;  %1161 = vrot.lane.b32.xlu0 %v3125_v62, %s2757_s24 }
  0xe3   : > { %v580_v43 = vpop.permute.xlu1 %579  ;;  %v578_v32 = vpop.permute.xlu0 %577 }
  0xe4   : > { %661 = vst.msk [vmem:[#allocation2 + $0x78] sm:$0xff] %vm645_vm2, %v580_v43  ;;  %660 = vst.msk [vmem:[#allocation2 + $0x70] sm:$0xff] %vm645_vm2, %v578_v32  ;;  %v2491_v32 = vld [vmem:[%s2805_s19 + $0x69] sm:$0xff] }
  0xe5   : > { %1323 = vrot.lane.b32.xlu1 %v2870_v20, %s2758_s25  ;;  %1163 = vrot.lane.b32.xlu0 %v3122_v61, %s2757_s24 }
  0xe7   : > { %v584_v42 = vpop.permute.xlu1 %583  ;;  %v582_v9 = vpop.permute.xlu0 %581 }
  0xe8   : > { %663 = vst.msk [vmem:[#allocation2 + $0x88] sm:$0xff] %vm645_vm2, %v584_v42  ;;  %662 = vst.msk [vmem:[#allocation2 + $0x80] sm:$0xff] %vm645_vm2, %v582_v9 }
  0xe9   : > { %1325 = vrot.lane.b32.xlu1 %v2867_v19, %s2758_s25  ;;  %1355 = vrot.lane.b32.xlu0 %v2959_v39, %s2758_s25 }
  0xeb   : > { %v588_v8 = vpop.permute.xlu1 %587  ;;  %v586_v62 = vpop.permute.xlu0 %585 }
  0xec   : > { %665 = vst.msk [vmem:[#allocation2 + $0x98] sm:$0xff] %vm645_vm2, %v588_v8  ;;  %664 = vst.msk [vmem:[#allocation2 + $0x90] sm:$0xff] %vm645_vm2, %v586_v62 }
  0xed   : > { %1516 = vrot.lane.b32.xlu1 %v2825_v5, %s2759_s26  ;;  %1357 = vrot.lane.b32.xlu0 %v2950_v38, %s2758_s25  ;;  %v1842_v5 = vld [vmem:[%s3909_s1] sm:$0xff]  ;;  %v1843_v38 = vld [vmem:[%s3909_s1 + $0x8] sm:$0xff] }
  0xee   : > { %v2682_v33 = vpack.c.bf16 %v1843_v38, %v1842_v5  ;;  %v2428_v5 = vld [vmem:[%s2805_s19 + $0x62] sm:$0xff] }
  0xef   : > { %v592_v20 = vpop.permute.xlu1 %591  ;;  %v590_v61 = vpop.permute.xlu0 %589 }
  0xf0   : > { %667 = vst.msk [vmem:[#allocation2 + $0xa8] sm:$0xff] %vm645_vm2, %v592_v20  ;;  %666 = vst.msk [vmem:[#allocation2 + $0xa0] sm:$0xff] %vm645_vm2, %v590_v61  ;;  %2683 = vmatprep.subr.bf16.mxu0 %v2682_v33  ;;  %2690 = vmatprep.subr.bf16.mxu1 %v2682_v33  ;;  %v3923_v20 = vld [vmem:[#allocation6_spill] sm:$0xff]  ;;  %v3924_v61 = vld [vmem:[#allocation4_spill] sm:$0xff] }
  0xf1   : > { %972 = vrot.lane.b32.xlu1 %v2999_v47, %s2756_s23  ;;  %1548 = vrot.lane.b32.xlu0 %v2999_v47, %s2759_s26 }
  0xf2   : > { %2685 = vmatpush3.bf16.msra.mxu0 %v2682_v33  ;;  %2693 = vmatpush3.bf16.msra.mxu1 %v2682_v33 }
  0xf3   : > { %v596_v19 = vpop.permute.xlu1 %595  ;;  %v594_v39 = vpop.permute.xlu0 %593  ;;  %2687 = vmatprep.subr.bf16.mxu0 %v2686_v37  ;;  %2691 = vmatprep.subr.bf16.mxu1 %v2686_v37 }
  0xf4   : > { %669 = vst.msk [vmem:[#allocation2 + $0xb8] sm:$0xff] %vm645_vm2, %v596_v19  ;;  %668 = vst.msk [vmem:[#allocation2 + $0xb0] sm:$0xff] %vm645_vm2, %v594_v39 }
  0xf5   : > { %1550 = vrot.lane.b32.xlu1 %v2996_v46, %s2759_s26  ;;  %1518 = vrot.lane.b32.xlu0 %v2822_v4, %s2759_s26 }
  0xf6   : > { %2689 = vmatpush3.bf16.msra.mxu0 %v2686_v37  ;;  %2694 = vmatpush3.bf16.msra.mxu1 %v2686_v37 }
  0xf7   : > { %v600_v47 = vpop.permute.xlu1 %599  ;;  %v598_v34 = vpop.permute.xlu0 %597  ;;  %2632 = vmatprep.subr.msk.mxu0 %vm1984_vm3, %v1846_v12  ;;  %2692 = vmatprep.subr.msk.mxu1 %vm1984_vm3, %v1846_v12 }
  0xf8   : > { %671 = vst.msk [vmem:[#allocation2 + $0xc8] sm:$0xff] %vm645_vm2, %v600_v47  ;;  %670 = vst.msk [vmem:[#allocation2 + $0xc0] sm:$0xff] %vm645_vm2, %v598_v34  ;;  %v2523_v47 = vld [vmem:[%s2805_s19 + $0x6a] sm:$0xff] }
  0xf9   : > { %1741 = vrot.lane.b32.xlu1 %v3135_v1, %s2760_s8  ;;  %1709 = vrot.lane.b32.xlu0 %v3082_v11, %s2760_s8 }
  0xfa   : > { %2633 = vmatpush3.msk.msra.mxu0 %vm1984_vm3, %v1846_v12  ;;  %2695 = vmatpush3.msk.msra.mxu1 %vm1984_vm3, %v1846_v12 }
  0xfb   : > { %v604_v21 = vpop.permute.xlu1 %603  ;;  %v602_v30 = vpop.permute.xlu0 %601 }
  0xfc   : > { %673 = vst.msk [vmem:[#allocation2 + $0xd8] sm:$0xff] %vm645_vm2, %v604_v21  ;;  %672 = vst.msk [vmem:[#allocation2 + $0xd0] sm:$0xff] %vm645_vm2, %v602_v30 }
  0xfd   : > { %974 = vrot.lane.b32.xlu1 %v2996_v46, %s2756_s23  ;;  %942 = vrot.lane.b32.xlu0 %v2822_v4, %s2756_s23 }
  0xff   : > { %v608_v16 = vpop.permute.xlu1 %607  ;;  %v606_v59 = vpop.permute.xlu0 %605 }
 0x100   : > { %675 = vst.msk [vmem:[#allocation2 + $0xe8] sm:$0xff] %vm645_vm2, %v608_v16  ;;  %674 = vst.msk [vmem:[#allocation2 + $0xe0] sm:$0xff] %vm645_vm2, %v606_v59 }
 0x101   : > { %1165 = vrot.lane.b32.xlu1 %v3135_v1, %s2757_s24  ;;  %1133 = vrot.lane.b32.xlu0 %v3082_v11, %s2757_s24 }
 0x103   : > { %v612_v4 = vpop.permute.xlu1 %611  ;;  %v610_v46 = vpop.permute.xlu0 %609 }
 0x104   : > { %677 = vst.msk [vmem:[#allocation2 + $0xf8] sm:$0xff] %vm645_vm2, %v612_v4  ;;  %676 = vst.msk [vmem:[#allocation2 + $0xf0] sm:$0xff] %vm645_vm2, %v610_v46  ;;  %v2508_v4 = vld [vmem:[%s2805_s19 + $0x139] sm:$0xff] }
 0x105   : > { %1743 = vrot.lane.b32.xlu1 %v3132_v63, %s2760_s8  ;;  %1711 = vrot.lane.b32.xlu0 %v3079_v10, %s2760_s8 }
 0x107   : > { %v746_v60 = vpop.permute.xlu1 %745  ;;  %v744_v54 = vpop.permute.xlu0 %743 }
 0x108   : > { %841 = vst.msk [vmem:[#allocation2 + $0x8] sm:$0xff] %vm839_vm4, %v746_v60  ;;  %840 = vst.msk [vmem:[#allocation2] sm:$0xff] %vm839_vm4, %v744_v54  ;;  %v2493_v54 = vld [vmem:[%s2805_s19 + $0x81] sm:$0xff] }
 0x109   : > { %1167 = vrot.lane.b32.xlu1 %v3132_v63, %s2757_s24  ;;  %1135 = vrot.lane.b32.xlu0 %v3079_v10, %s2757_s24 }
 0x10b   : > { %v750_v11 = vpop.permute.xlu1 %749  ;;  %v748_v1 = vpop.permute.xlu0 %747 }
 0x10c   : > { %843 = vst.msk [vmem:[#allocation2 + $0x18] sm:$0xff] %vm839_vm4, %v750_v11  ;;  %842 = vst.msk [vmem:[#allocation2 + $0x10] sm:$0xff] %vm839_vm4, %v748_v1 }
 0x10d   : > { %1359 = vrot.lane.b32.xlu1 %v2965_v41, %s2758_s25  ;;  %1327 = vrot.lane.b32.xlu0 %v2885_v23, %s2758_s25 }
 0x10f   : > { %v754_v58 = vpop.permute.xlu1 %753  ;;  %v752_v29 = vpop.permute.xlu0 %751 }
 0x110   : > { %845 = vst.msk [vmem:[#allocation2 + $0x28] sm:$0xff] %vm839_vm4, %v754_v58  ;;  %844 = vst.msk [vmem:[#allocation2 + $0x20] sm:$0xff] %vm839_vm4, %v752_v29  ;;  %v2540_v58 = vld [vmem:[%s2805_s19 + $0x13a] sm:$0xff] }
 0x111   : > { %1361 = vrot.lane.b32.xlu1 %v2962_v40, %s2758_s25  ;;  %1329 = vrot.lane.b32.xlu0 %v2880_v22, %s2758_s25  ;;  %v2524_v29 = vld [vmem:[%s2805_s19 + $0x7a] sm:$0xff] }
 0x113   : > { %v758_v10 = vpop.permute.xlu1 %757  ;;  %v756_v63 = vpop.permute.xlu0 %755 }
 0x114   : > { %847 = vst.msk [vmem:[#allocation2 + $0x38] sm:$0xff] %vm839_vm4, %v758_v10  ;;  %846 = vst.msk [vmem:[#allocation2 + $0x30] sm:$0xff] %vm839_vm4, %v756_v63 }
 0x115   : > { %1552 = vrot.lane.b32.xlu1 %v3019_v51, %s2759_s26  ;;  %1520 = vrot.lane.b32.xlu0 %v2835_v7, %s2759_s26 }
 0x117   : > { %v762_v23 = vpop.permute.xlu1 %761  ;;  %v760_v41 = vpop.permute.xlu0 %759 }
 0x118   : > { %849 = vst.msk [vmem:[#allocation2 + $0x48] sm:$0xff] %vm839_vm4, %v762_v23  ;;  %848 = vst.msk [vmem:[#allocation2 + $0x40] sm:$0xff] %vm839_vm4, %v760_v41 }
 0x119   : > { %976 = vrot.lane.b32.xlu1 %v3019_v51, %s2756_s23  ;;  %944 = vrot.lane.b32.xlu0 %v2835_v7, %s2756_s23 }
 0x11b   : > { %v766_v22 = vpop.permute.xlu1 %765  ;;  %v764_v40 = vpop.permute.xlu0 %763 }
 0x11c   : > { %851 = vst.msk [vmem:[#allocation2 + $0x58] sm:$0xff] %vm839_vm4, %v766_v22  ;;  %850 = vst.msk [vmem:[#allocation2 + $0x50] sm:$0xff] %vm839_vm4, %v764_v40 }
 0x11d   : > { %1554 = vrot.lane.b32.xlu1 %v3016_v50, %s2759_s26  ;;  %1522 = vrot.lane.b32.xlu0 %v2832_v6, %s2759_s26 }
 0x11f   : > { %v770_v18 = vpop.permute.xlu1 %769  ;;  %v768_v55 = vpop.permute.xlu0 %767 }
 0x120   : > { %853 = vst.msk [vmem:[#allocation2 + $0x68] sm:$0xff] %vm839_vm4, %v770_v18  ;;  %852 = vst.msk [vmem:[#allocation2 + $0x60] sm:$0xff] %vm839_vm4, %v768_v55 }
 0x121   : > { %1745 = vrot.lane.b32.xlu1 %v3145_v15, %s2760_s8  ;;  %1713 = vrot.lane.b32.xlu0 %v3092_v14, %s2760_s8 }
 0x123   : > { %v774_v7 = vpop.permute.xlu1 %773  ;;  %v772_v51 = vpop.permute.xlu0 %771 }
 0x124   : > { %855 = vst.msk [vmem:[#allocation2 + $0x78] sm:$0xff] %vm839_vm4, %v774_v7  ;;  %854 = vst.msk [vmem:[#allocation2 + $0x70] sm:$0xff] %vm839_vm4, %v772_v51  ;;  %v2541_v7 = vld [vmem:[%s2805_s19 + $0x142] sm:$0xff] }
 0x125   : > { %978 = vrot.lane.b32.xlu1 %v3016_v50, %s2756_s23  ;;  %946 = vrot.lane.b32.xlu0 %v2832_v6, %s2756_s23  ;;  %v2525_v51 = vld [vmem:[%s2805_s19 + $0x82] sm:$0xff] }
 0x127   : > { %v778_v17 = vpop.permute.xlu1 %777  ;;  %v776_v56 = vpop.permute.xlu0 %775 }
 0x128   : > { %857 = vst.msk [vmem:[#allocation2 + $0x88] sm:$0xff] %vm839_vm4, %v778_v17  ;;  %856 = vst.msk [vmem:[#allocation2 + $0x80] sm:$0xff] %vm839_vm4, %v776_v56 }
 0x129   : > { %1169 = vrot.lane.b32.xlu1 %v3145_v15, %s2757_s24  ;;  %1137 = vrot.lane.b32.xlu0 %v3092_v14, %s2757_s24 }
 0x12b   : > { %v782_v57 = vpop.permute.xlu1 %781  ;;  %v780_v28 = vpop.permute.xlu0 %779 }
 0x12c   : > { %859 = vst.msk [vmem:[#allocation2 + $0x98] sm:$0xff] %vm839_vm4, %v782_v57  ;;  %858 = vst.msk [vmem:[#allocation2 + $0x90] sm:$0xff] %vm839_vm4, %v780_v28 }
 0x12d   : > { %1747 = vrot.lane.b32.xlu1 %v3142_v3, %s2760_s8  ;;  %1715 = vrot.lane.b32.xlu0 %v3089_v13, %s2760_s8 }
 0x12f   : > { %v786_v6 = vpop.permute.xlu1 %785  ;;  %v784_v50 = vpop.permute.xlu0 %783 }
 0x130   : > { %861 = vst.msk [vmem:[#allocation2 + $0xa8] sm:$0xff] %vm839_vm4, %v786_v6  ;;  %860 = vst.msk [vmem:[#allocation2 + $0xa0] sm:$0xff] %vm839_vm4, %v784_v50 }
 0x131   : > { %1171 = vrot.lane.b32.xlu1 %v3142_v3, %s2757_s24  ;;  %1139 = vrot.lane.b32.xlu0 %v3089_v13, %s2757_s24  ;;  %v2490_v13 = vld [vmem:[%s2805_s19 + $0x61] sm:$0xff] }
 0x133   : > { %v790_v14 = vpop.permute.xlu1 %789  ;;  %v788_v15 = vpop.permute.xlu0 %787 }
 0x134   : > { %863 = vst.msk [vmem:[#allocation2 + $0xb8] sm:$0xff] %vm839_vm4, %v790_v14  ;;  %862 = vst.msk [vmem:[#allocation2 + $0xb0] sm:$0xff] %vm839_vm4, %v788_v15  ;;  %v2462_v14 = vld [vmem:[%s2805_s19 + $0x90] sm:$0xff] }
 0x135   : > { %1363 = vrot.lane.b32.xlu1 %v2985_v45, %s2758_s25  ;;  %1331 = vrot.lane.b32.xlu0 %v2891_v25, %s2758_s25  ;;  %v3922_v25 = vld [vmem:[#allocation3_spill] sm:$0xff] }
 0x137   : > { %v794_v31 = vpop.permute.xlu1 %793  ;;  %v792_v0 = vpop.permute.xlu0 %791 }
 0x138   : > { %865 = vst.msk [vmem:[#allocation2 + $0xc8] sm:$0xff] %vm839_vm4, %v794_v31  ;;  %864 = vst.msk [vmem:[#allocation2 + $0xc0] sm:$0xff] %vm839_vm4, %v792_v0  ;;  %v2463_v0 = vld [vmem:[%s2805_s19 + $0x98] sm:$0xff] }
 0x139   : > { %1365 = vrot.lane.b32.xlu1 %v2982_v44, %s2758_s25  ;;  %1333 = vrot.lane.b32.xlu0 %v2888_v24, %s2758_s25  ;;  %v2507_v24 = vld [vmem:[%s2805_s19 + $0x129] sm:$0xff] }
 0x13b   : > { %v798_v3 = vpop.permute.xlu1 %797  ;;  %v796_v45 = vpop.permute.xlu0 %795 }
 0x13c   : > { %867 = vst.msk [vmem:[#allocation2 + $0xd8] sm:$0xff] %vm839_vm4, %v798_v3  ;;  %866 = vst.msk [vmem:[#allocation2 + $0xd0] sm:$0xff] %vm839_vm4, %v796_v45  ;;  %v2510_v45 = vld [vmem:[%s2805_s19 + $0x151] sm:$0xff] }
 0x13d   : > { %1556 = vrot.lane.b32.xlu1 %v3922_v25, %s2759_s26  ;;  %1524 = vrot.lane.b32.xlu0 %v2490_v13, %s2759_s26  ;;  %v2494_v25 = vld [vmem:[%s2805_s19 + $0x91] sm:$0xff] }
 0x13f   : > { %v802_v43 = vpop.permute.xlu1 %801  ;;  %v800_v44 = vpop.permute.xlu0 %799 }
 0x140   : > { %869 = vst.msk [vmem:[#allocation2 + $0xe8] sm:$0xff] %vm839_vm4, %v802_v43  ;;  %868 = vst.msk [vmem:[#allocation2 + $0xe0] sm:$0xff] %vm839_vm4, %v800_v44  ;;  %v2511_v44 = vld [vmem:[%s2805_s19 + $0x159] sm:$0xff] }
 0x141   : > { %980 = vrot.lane.b32.xlu1 %v2412_v2, %s2756_s23  ;;  %948 = vrot.lane.b32.xlu0 %v2490_v13, %s2756_s23 }
 0x143   : > { %v806_v42 = vpop.permute.xlu1 %805  ;;  %v804_v9 = vpop.permute.xlu0 %803 }
 0x144   : > { %871 = vst.msk [vmem:[#allocation2 + $0xf8] sm:$0xff] %vm839_vm4, %v806_v42  ;;  %870 = vst.msk [vmem:[#allocation2 + $0xf0] sm:$0xff] %vm839_vm4, %v804_v9  ;;  %v2542_v9 = vld [vmem:[%s2805_s19 + $0x152] sm:$0xff] }
 0x145   : > { %1558 = vrot.lane.b32.xlu1 %v2507_v24, %s2759_s26  ;;  %1526 = vrot.lane.b32.xlu0 %v2491_v32, %s2759_s26 }
 0x147   : > { %v939_v8 = vpop.permute.xlu1 %938  ;;  %v937_v62 = vpop.permute.xlu0 %936 }
 0x148   : > { %1034 = vst.msk [vmem:[#allocation2 + $0x8] sm:$0xff] %vm1032_vm5, %v939_v8  ;;  %1033 = vst.msk [vmem:[#allocation2] sm:$0xff] %vm1032_vm5, %v937_v62  ;;  %v2526_v8 = vld [vmem:[%s2805_s19 + $0x92] sm:$0xff] }
 0x149   : > { %1749 = vrot.lane.b32.xlu1 %v3923_v20, %s2760_s8  ;;  %1717 = vrot.lane.b32.xlu0 %v3924_v61, %s2760_s8 }
 0x14b   : > { %v969_v19 = vpop.permute.xlu1 %968  ;;  %v941_v39 = vpop.permute.xlu0 %940 }
 0x14c   : > { %1049 = vst.msk [vmem:[#allocation2 + $0x80] sm:$0xff] %vm1032_vm5, %v969_v19  ;;  %1035 = vst.msk [vmem:[#allocation2 + $0x10] sm:$0xff] %vm1032_vm5, %v941_v39 }
 0x14d   : > { %982 = vrot.lane.b32.xlu1 %v2507_v24, %s2756_s23  ;;  %950 = vrot.lane.b32.xlu0 %v2491_v32, %s2756_s23  ;;  %v2495_v24 = vld [vmem:[%s2805_s19 + $0x99] sm:$0xff] }
 0x14f   : > { %v1130_v38 = vpop.permute.xlu1 %1129  ;;  %v971_v33 = vpop.permute.xlu0 %970 }
 0x150   : > { %1226 = vst.msk [vmem:[#allocation2] sm:$0xff] %vm1225_vm6, %v1130_v38 }
 0x151   : > { %1050 = vst.msk [vmem:[#allocation2 + $0x88] sm:$0xff] %vm1032_vm5, %v971_v33  ;;  %1173 = vrot.lane.b32.xlu1 %v3923_v20, %s2757_s24  ;;  %1141 = vrot.lane.b32.xlu0 %v2428_v5, %s2757_s24 }
 0x153   : > { %v1132_v34 = vpop.permute.xlu1 %1131  ;;  %v1162_v35 = vpop.permute.xlu0 %1161 }
 0x154   : > { %1227 = vst.msk [vmem:[#allocation2 + $0x8] sm:$0xff] %vm1225_vm6, %v1132_v34  ;;  %1242 = vst.msk [vmem:[#allocation2 + $0x80] sm:$0xff] %vm1225_vm6, %v1162_v35  ;;  %v2527_v34 = vld [vmem:[%s2805_s19 + $0x9a] sm:$0xff] }
 0x155   : > { %1751 = vrot.lane.b32.xlu1 %v3925_v36, %s2760_s8  ;;  %1719 = vrot.lane.b32.xlu0 %v2523_v47, %s2760_s8 }
 0x157   : > { %v1324_v37 = vpop.permute.xlu1 %1323  ;;  %v1164_v21 = vpop.permute.xlu0 %1163 }
 0x158   : > { %1420 = vst.msk [vmem:[#allocation2] sm:$0xff] %vm1419_vm7, %v1324_v37 }
 0x159   : > { %1243 = vst.msk [vmem:[#allocation2 + $0x88] sm:$0xff] %vm1225_vm6, %v1164_v21  ;;  %1175 = vrot.lane.b32.xlu1 %v3925_v36, %s2757_s24  ;;  %1143 = vrot.lane.b32.xlu0 %v2523_v47, %s2757_s24  ;;  %v2543_v47 = vld [vmem:[%s2805_s19 + $0x15a] sm:$0xff] }
 0x15b   : > { %v1326_v30 = vpop.permute.xlu1 %1325  ;;  %v1356_v12 = vpop.permute.xlu0 %1355 }
 0x15c   : > { %1421 = vst.msk [vmem:[#allocation2 + $0x8] sm:$0xff] %vm1419_vm7, %v1326_v30  ;;  %1436 = vst.msk [vmem:[#allocation2 + $0x80] sm:$0xff] %vm1419_vm7, %v1356_v12 }
 0x15d   : > { %1367 = vrot.lane.b32.xlu1 %v3005_v49, %s2758_s25  ;;  %1335 = vrot.lane.b32.xlu0 %v2903_v27, %s2758_s25  ;;  %v2492_v49 = vld [vmem:[%s2805_s19 + $0x79] sm:$0xff] }
 0x15f   : > { %v1517_v16 = vpop.permute.xlu1 %1516  ;;  %v1358_v59 = vpop.permute.xlu0 %1357 }
 0x160   : > { %1613 = vst.msk [vmem:[#allocation2] sm:$0xff] %vm1612_vm8, %v1517_v16  ;;  %v2480_v16 = vld [vmem:[%s2805_s19 + $0x168] sm:$0xff] }
 0x161   : > { %1437 = vst.msk [vmem:[#allocation2 + $0x88] sm:$0xff] %vm1419_vm7, %v1358_v59  ;;  %1369 = vrot.lane.b32.xlu1 %v3002_v48, %s2758_s25  ;;  %1337 = vrot.lane.b32.xlu0 %v2900_v26, %s2758_s25  ;;  %v2509_v26 = vld [vmem:[%s2805_s19 + $0x141] sm:$0xff] }
 0x162   : > { %v2464_v59 = vld [vmem:[%s2805_s19 + $0xa8] sm:$0xff] }
 0x163   : > { %v973_v46 = vpop.permute.xlu1 %972  ;;  %v1549_v60 = vpop.permute.xlu0 %1548 }
 0x164   : > { %1051 = vst.msk [vmem:[#allocation2 + $0x90] sm:$0xff] %vm1032_vm5, %v973_v46  ;;  %v2481_v46 = vld [vmem:[%s2805_s19 + $0x170] sm:$0xff] }
 0x165   : > { %1629 = vst.msk [vmem:[#allocation2 + $0x80] sm:$0xff] %vm1612_vm8, %v1549_v60  ;;  %1560 = vrot.lane.b32.xlu1 %v2508_v4, %s2759_s26  ;;  %1528 = vrot.lane.b32.xlu0 %v2492_v49, %s2759_s26  ;;  %v2465_v60 = vld [vmem:[%s2805_s19 + $0xb0] sm:$0xff] }
 0x167   : > { %v1551_v27 = vpop.permute.xlu1 %1550  ;;  %v1519_v48 = vpop.permute.xlu0 %1518 }
 0x168   : > { %1630 = vst.msk [vmem:[#allocation2 + $0x88] sm:$0xff] %vm1612_vm8, %v1551_v27  ;;  %1614 = vst.msk [vmem:[#allocation2 + $0x8] sm:$0xff] %vm1612_vm8, %v1519_v48 }
 0x169   : > { %984 = vrot.lane.b32.xlu1 %v2508_v4, %s2756_s23  ;;  %952 = vrot.lane.b32.xlu0 %v2492_v49, %s2756_s23 }
 0x16b   : > { %v1742_v11 = vpop.permute.xlu1 %1741  ;;  %v1710_v1 = vpop.permute.xlu0 %1709 }
 0x16c   : > { %1822 = vst.msk [vmem:[#allocation2 + $0x80] sm:$0xff] %vm1805_vm9, %v1742_v11  ;;  %1806 = vst.msk [vmem:[#allocation2] sm:$0xff] %vm1805_vm9, %v1710_v1 }
 0x16d   : > { %1562 = vrot.lane.b32.xlu1 %v2509_v26, %s2759_s26  ;;  %1530 = vrot.lane.b32.xlu0 %v2493_v54, %s2759_s26 }
 0x16f   : > { %v975_v10 = vpop.permute.xlu1 %974  ;;  %v943_v63 = vpop.permute.xlu0 %942 }
 0x170   : > { %1052 = vst.msk [vmem:[#allocation2 + $0x98] sm:$0xff] %vm1032_vm5, %v975_v10  ;;  %1036 = vst.msk [vmem:[#allocation2 + $0x18] sm:$0xff] %vm1032_vm5, %v943_v63  ;;  %v2513_v10 = vld [vmem:[%s2805_s19 + $0x171] sm:$0xff] }
 0x171   : > { %1753 = vrot.lane.b32.xlu1 %v2540_v58, %s2760_s8  ;;  %1721 = vrot.lane.b32.xlu0 %v2524_v29, %s2760_s8  ;;  %v2497_v63 = vld [vmem:[%s2805_s19 + $0xb1] sm:$0xff] }
 0x173   : > { %v1166_v23 = vpop.permute.xlu1 %1165  ;;  %v1134_v41 = vpop.permute.xlu0 %1133  ;;  %v1847_v22 = vld [vmem:[#allocation2] sm:$0xff] }
 0x174   : > { %v1863_v40 = vld [vmem:[#allocation2 + $0x80] sm:$0xff]  ;;  %1244 = vst.msk [vmem:[#allocation2 + $0x90] sm:$0xff] %vm1225_vm6, %v1166_v23  ;;  %1228 = vst.msk [vmem:[#allocation2 + $0x10] sm:$0xff] %vm1225_vm6, %v1134_v41  ;;  %2634 = vmatprep.mubr.msk.f32.mxu0 %vm1887_vm10, %v1847_v22  ;;  %v2544_v22 = vld [vmem:[%s2805_s19 + $0x16a] sm:$0xff] }
 0x175   : > { %2658 = vmatprep.mubr.msk.f32.mxu1 %vm1887_vm10, %v1863_v40  ;;  %986 = vrot.lane.b32.xlu1 %v2509_v26, %s2756_s23  ;;  %v2512_v26 = vld [vmem:[%s2805_s19 + $0x169] sm:$0xff] }
 0x176   : > { %954 = vrot.lane.b32.xlu0 %v2493_v54, %s2756_s23  ;;  %v2496_v54 = vld [vmem:[%s2805_s19 + $0xa9] sm:$0xff] }
 0x177   : > { %v1744_v18 = vpop.permute.xlu1 %1743  ;;  %v1712_v55 = vpop.permute.xlu0 %1711  ;;  %v2528_v40 = vld [vmem:[%s2805_s19 + $0xaa] sm:$0xff] }
 0x178   : > { %1823 = vst.msk [vmem:[#allocation2 + $0x88] sm:$0xff] %vm1805_vm9, %v1744_v18  ;;  %1807 = vst.msk [vmem:[#allocation2 + $0x8] sm:$0xff] %vm1805_vm9, %v1712_v55 }
 0x179   : > { %1177 = vrot.lane.b32.xlu1 %v2540_v58, %s2757_s24 }
 0x17a   : > { %1145 = vrot.lane.b32.xlu0 %v2524_v29, %s2757_s24 }
 0x17b   : > { %v1168_v17 = vpop.permute.xlu1 %1167  ;;  %v1136_v56 = vpop.permute.xlu0 %1135 }
 0x17c   : > { %1245 = vst.msk [vmem:[#allocation2 + $0x98] sm:$0xff] %vm1225_vm6, %v1168_v17  ;;  %1229 = vst.msk [vmem:[#allocation2 + $0x18] sm:$0xff] %vm1225_vm6, %v1136_v56 }
 0x17d   : > { %1755 = vrot.lane.b32.xlu1 %v2541_v7, %s2760_s8 }
 0x17e   : > { %1723 = vrot.lane.b32.xlu0 %v2525_v51, %s2760_s8 }
 0x17f   : > { %v1360_v57 = vpop.permute.xlu1 %1359  ;;  %v1328_v28 = vpop.permute.xlu0 %1327  ;;  %v1848_v6 = vld [vmem:[#allocation2 + $0x8] sm:$0xff] }
 0x180   : > { %v1864_v50 = vld [vmem:[#allocation2 + $0x88] sm:$0xff]  ;;  %1438 = vst.msk [vmem:[#allocation2 + $0x90] sm:$0xff] %vm1419_vm7, %v1360_v57  ;;  %1422 = vst.msk [vmem:[#allocation2 + $0x10] sm:$0xff] %vm1419_vm7, %v1328_v28  ;;  %2635 = vmatmul.mubr.msk.f32.vlgmr.msra.gmra.mrb[0].mxu0 %vm1887_vm10, %v1848_v6  ;;  %v2545_v6 = vld [vmem:[%s2805_s19 + $0x172] sm:$0xff] }
 0x181   : > { %2659 = vmatmul.mubr.msk.f32.vlgmr.msra.gmra.mrb[0].mxu1 %vm1887_vm10, %v1864_v50  ;;  %1179 = vrot.lane.b32.xlu1 %v2541_v7, %s2757_s24  ;;  %v2529_v50 = vld [vmem:[%s2805_s19 + $0xb2] sm:$0xff] }
 0x182   : > { %1147 = vrot.lane.b32.xlu0 %v2525_v51, %s2757_s24 }
 0x183   : > { %v1362_v15 = vpop.permute.xlu1 %1361  ;;  %v1330_v31 = vpop.permute.xlu0 %1329 }
 0x184   : > { %1439 = vst.msk [vmem:[#allocation2 + $0x98] sm:$0xff] %vm1419_vm7, %v1362_v15  ;;  %1423 = vst.msk [vmem:[#allocation2 + $0x18] sm:$0xff] %vm1419_vm7, %v1330_v31 }
 0x185   : > { %1371 = vrot.lane.b32.xlu1 %v3025_v53, %s2758_s25 }
 0x186   : > { %1339 = vrot.lane.b32.xlu0 %v2462_v14, %s2758_s25 }
 0x187   : > { %v1553_v13 = vpop.permute.xlu1 %1552  ;;  %v1521_v3 = vpop.permute.xlu0 %1520 }
 0x188   : > { %1631 = vst.msk [vmem:[#allocation2 + $0x90] sm:$0xff] %vm1612_vm8, %v1553_v13  ;;  %1615 = vst.msk [vmem:[#allocation2 + $0x10] sm:$0xff] %vm1612_vm8, %v1521_v3 }
 0x189   : > { %1373 = vrot.lane.b32.xlu1 %v3022_v52, %s2758_s25 }
 0x18a   : > { %1341 = vrot.lane.b32.xlu0 %v2463_v0, %s2758_s25 }
 0x18b   : > { %v977_v2 = vpop.permute.xlu1 %976  ;;  %v945_v53 = vpop.permute.xlu0 %944 }
 0x18c   : > { %1053 = vst.msk [vmem:[#allocation2 + $0xa0] sm:$0xff] %vm1032_vm5, %v977_v2  ;;  %1037 = vst.msk [vmem:[#allocation2 + $0x20] sm:$0xff] %vm1032_vm5, %v945_v53 }
 0x18d   : > { %1564 = vrot.lane.b32.xlu1 %v2510_v45, %s2759_s26 }
 0x18e   : > { %1532 = vrot.lane.b32.xlu0 %v2494_v25, %s2759_s26 }
 0x18f   : > { %v1555_v43 = vpop.permute.xlu1 %1554  ;;  %v1523_v52 = vpop.permute.xlu0 %1522 }
 0x190   : > { %1632 = vst.msk [vmem:[#allocation2 + $0x98] sm:$0xff] %vm1612_vm8, %v1555_v43  ;;  %1616 = vst.msk [vmem:[#allocation2 + $0x18] sm:$0xff] %vm1612_vm8, %v1523_v52  ;;  %v2483_v43 = vld [vmem:[%s2805_s19 + $0x188] sm:$0xff] }
 0x191   : > { %988 = vrot.lane.b32.xlu1 %v2510_v45, %s2756_s23  ;;  %v2482_v45 = vld [vmem:[%s2805_s19 + $0x180] sm:$0xff]  ;;  %v2467_v52 = vld [vmem:[%s2805_s19 + $0xc8] sm:$0xff] }
 0x192   : > { %956 = vrot.lane.b32.xlu0 %v2494_v25, %s2756_s23  ;;  %v2466_v25 = vld [vmem:[%s2805_s19 + $0xc0] sm:$0xff] }
 0x193   : > { %v1746_v32 = vpop.permute.xlu1 %1745  ;;  %v1714_v42 = vpop.permute.xlu0 %1713 }
 0x194   : > { %1824 = vst.msk [vmem:[#allocation2 + $0x90] sm:$0xff] %vm1805_vm9, %v1746_v32  ;;  %1808 = vst.msk [vmem:[#allocation2 + $0x10] sm:$0xff] %vm1805_vm9, %v1714_v42  ;;  %v2514_v32 = vld [vmem:[%s2805_s19 + $0x181] sm:$0xff] }
 0x195   : > { %1566 = vrot.lane.b32.xlu1 %v2511_v44, %s2759_s26  ;;  %v2498_v42 = vld [vmem:[%s2805_s19 + $0xc1] sm:$0xff] }
 0x196   : > { %1534 = vrot.lane.b32.xlu0 %v2495_v24, %s2759_s26 }
 0x197   : > { %v979_v62 = vpop.permute.xlu1 %978  ;;  %v947_v20 = vpop.permute.xlu0 %946 }
 0x198   : > { %1054 = vst.msk [vmem:[#allocation2 + $0xa8] sm:$0xff] %vm1032_vm5, %v979_v62  ;;  %1038 = vst.msk [vmem:[#allocation2 + $0x28] sm:$0xff] %vm1032_vm5, %v947_v20 }
 0x199   : > { %1757 = vrot.lane.b32.xlu1 %v2542_v9, %s2760_s8 }
 0x19a   : > { %1725 = vrot.lane.b32.xlu0 %v2526_v8, %s2760_s8 }
 0x19b   : > { %v1170_v61 = vpop.permute.xlu1 %1169  ;;  %v1138_v19 = vpop.permute.xlu0 %1137  ;;  %v1849_v39 = vld [vmem:[#allocation2 + $0x10] sm:$0xff] }
 0x19c   : > { %v1865_v5 = vld [vmem:[#allocation2 + $0x90] sm:$0xff]  ;;  %1246 = vst.msk [vmem:[#allocation2 + $0xa0] sm:$0xff] %vm1225_vm6, %v1170_v61  ;;  %1230 = vst.msk [vmem:[#allocation2 + $0x20] sm:$0xff] %vm1225_vm6, %v1138_v19  ;;  %2637 = vmatprep.mubr.msk.f32.mxu0 %vm1887_vm10, %v1849_v39 }
 0x19d   : > { %2661 = vmatprep.mubr.msk.f32.mxu1 %vm1887_vm10, %v1865_v5  ;;  %990 = vrot.lane.b32.xlu1 %v2511_v44, %s2756_s23  ;;  %v2515_v61 = vld [vmem:[%s2805_s19 + $0x189] sm:$0xff] }
 0x19e   : > { %958 = vrot.lane.b32.xlu0 %v2495_v24, %s2756_s23  ;;  %v2499_v19 = vld [vmem:[%s2805_s19 + $0xc9] sm:$0xff] }
 0x19f   : > { %v1748_v38 = vpop.permute.xlu1 %1747  ;;  %v1716_v33 = vpop.permute.xlu0 %1715 }
 0x1a0   : > { %1825 = vst.msk [vmem:[#allocation2 + $0x98] sm:$0xff] %vm1805_vm9, %v1748_v38  ;;  %1809 = vst.msk [vmem:[#allocation2 + $0x18] sm:$0xff] %vm1805_vm9, %v1716_v33  ;;  %v2546_v38 = vld [vmem:[%s2805_s19 + $0x182] sm:$0xff] }
 0x1a1   : > { %1181 = vrot.lane.b32.xlu1 %v2542_v9, %s2757_s24  ;;  %v2530_v33 = vld [vmem:[%s2805_s19 + $0xc2] sm:$0xff] }
 0x1a2   : > { %1149 = vrot.lane.b32.xlu0 %v2526_v8, %s2757_s24 }
 0x1a3   : > { %v1172_v35 = vpop.permute.xlu1 %1171  ;;  %v1140_v36 = vpop.permute.xlu0 %1139 }
 0x1a4   : > { %1247 = vst.msk [vmem:[#allocation2 + $0xa8] sm:$0xff] %vm1225_vm6, %v1172_v35  ;;  %1231 = vst.msk [vmem:[#allocation2 + $0x28] sm:$0xff] %vm1225_vm6, %v1140_v36 }
 0x1a5   : > { %1759 = vrot.lane.b32.xlu1 %v2543_v47, %s2760_s8 }
 0x1a6   : > { %1727 = vrot.lane.b32.xlu0 %v2527_v34, %s2760_s8 }
 0x1a7   : > { %v1364_v37 = vpop.permute.xlu1 %1363  ;;  %v1332_v21 = vpop.permute.xlu0 %1331  ;;  %v1850_v30 = vld [vmem:[#allocation2 + $0x18] sm:$0xff] }
 0x1a8   : > { %v1866_v12 = vld [vmem:[#allocation2 + $0x98] sm:$0xff]  ;;  %1440 = vst.msk [vmem:[#allocation2 + $0xa0] sm:$0xff] %vm1419_vm7, %v1364_v37  ;;  %1424 = vst.msk [vmem:[#allocation2 + $0x20] sm:$0xff] %vm1419_vm7, %v1332_v21  ;;  %2638 = vmatmul.mubr.msk.f32.gmra.mrb[2].mxu0 %vm1887_vm10, %v1850_v30 }
 0x1a9   : > { %2662 = vmatmul.mubr.msk.f32.gmra.mrb[2].mxu1 %vm1887_vm10, %v1866_v12  ;;  %1183 = vrot.lane.b32.xlu1 %v2543_v47, %s2757_s24 }
 0x1aa   : > { %1151 = vrot.lane.b32.xlu0 %v2527_v34, %s2757_s24 }
 0x1ab   : > { %v1366_v4 = vpop.permute.xlu1 %1365  ;;  %v1334_v49 = vpop.permute.xlu0 %1333 }
 0x1ac   : > { %1441 = vst.msk [vmem:[#allocation2 + $0xa8] sm:$0xff] %vm1419_vm7, %v1366_v4  ;;  %1425 = vst.msk [vmem:[#allocation2 + $0x28] sm:$0xff] %vm1419_vm7, %v1334_v49 }
 0x1ad   : > { %1375 = vrot.lane.b32.xlu1 %v2480_v16, %s2758_s25  ;;  %v2547_v16 = vld [vmem:[%s2805_s19 + $0x18a] sm:$0xff] }
 0x1ae   : > { %1343 = vrot.lane.b32.xlu0 %v2464_v59, %s2758_s25  ;;  %v2531_v59 = vld [vmem:[%s2805_s19 + $0xca] sm:$0xff] }
 0x1af   : > { %v1557_v27 = vpop.permute.xlu1 %1556  ;;  %v1525_v48 = vpop.permute.xlu0 %1524 }
 0x1b0   : > { %1633 = vst.msk [vmem:[#allocation2 + $0xa0] sm:$0xff] %vm1612_vm8, %v1557_v27  ;;  %1617 = vst.msk [vmem:[#allocation2 + $0x20] sm:$0xff] %vm1612_vm8, %v1525_v48 }
 0x1b1   : > { %1377 = vrot.lane.b32.xlu1 %v2481_v46, %s2758_s25 }
 0x1b2   : > { %1345 = vrot.lane.b32.xlu0 %v2465_v60, %s2758_s25 }
 0x1b3   : > { %v981_v11 = vpop.permute.xlu1 %980  ;;  %v949_v1 = vpop.permute.xlu0 %948 }
 0x1b4   : > { %1055 = vst.msk [vmem:[#allocation2 + $0xb0] sm:$0xff] %vm1032_vm5, %v981_v11  ;;  %1039 = vst.msk [vmem:[#allocation2 + $0x30] sm:$0xff] %vm1032_vm5, %v949_v1 }
 0x1b5   : > { %1568 = vrot.lane.b32.xlu1 %v2512_v26, %s2759_s26 }
 0x1b6   : > { %1536 = vrot.lane.b32.xlu0 %v2496_v54, %s2759_s26 }
 0x1b7   : > { %v1559_v58 = vpop.permute.xlu1 %1558  ;;  %v1527_v29 = vpop.permute.xlu0 %1526 }
 0x1b8   : > { %1634 = vst.msk [vmem:[#allocation2 + $0xa8] sm:$0xff] %vm1612_vm8, %v1559_v58  ;;  %1618 = vst.msk [vmem:[#allocation2 + $0x28] sm:$0xff] %vm1612_vm8, %v1527_v29  ;;  %v2485_v58 = vld [vmem:[%s2805_s19 + $0x1a0] sm:$0xff] }
 0x1b9   : > { %992 = vrot.lane.b32.xlu1 %v2512_v26, %s2756_s23  ;;  %v2484_v26 = vld [vmem:[%s2805_s19 + $0x198] sm:$0xff]  ;;  %v2469_v29 = vld [vmem:[%s2805_s19 + $0xe0] sm:$0xff] }
 0x1ba   : > { %960 = vrot.lane.b32.xlu0 %v2496_v54, %s2756_s23  ;;  %v2468_v54 = vld [vmem:[%s2805_s19 + $0xd8] sm:$0xff] }
 0x1bb   : > { %v1750_v23 = vpop.permute.xlu1 %1749  ;;  %v1718_v41 = vpop.permute.xlu0 %1717 }
 0x1bc   : > { %1826 = vst.msk [vmem:[#allocation2 + $0xa0] sm:$0xff] %vm1805_vm9, %v1750_v23  ;;  %1810 = vst.msk [vmem:[#allocation2 + $0x20] sm:$0xff] %vm1805_vm9, %v1718_v41  ;;  %v2516_v23 = vld [vmem:[%s2805_s19 + $0x199] sm:$0xff] }
 0x1bd   : > { %1570 = vrot.lane.b32.xlu1 %v2513_v10, %s2759_s26  ;;  %v2500_v41 = vld [vmem:[%s2805_s19 + $0xd9] sm:$0xff] }
 0x1be   : > { %1538 = vrot.lane.b32.xlu0 %v2497_v63, %s2759_s26 }
 0x1bf   : > { %v983_v18 = vpop.permute.xlu1 %982  ;;  %v951_v55 = vpop.permute.xlu0 %950 }
 0x1c0   : > { %1056 = vst.msk [vmem:[#allocation2 + $0xb8] sm:$0xff] %vm1032_vm5, %v983_v18  ;;  %1040 = vst.msk [vmem:[#allocation2 + $0x38] sm:$0xff] %vm1032_vm5, %v951_v55  ;;  %v2517_v18 = vld [vmem:[%s2805_s19 + $0x1a1] sm:$0xff] }
 0x1c1   : > { %1761 = vrot.lane.b32.xlu1 %v2544_v22, %s2760_s8  ;;  %v2501_v55 = vld [vmem:[%s2805_s19 + $0xe1] sm:$0xff] }
 0x1c2   : > { %1729 = vrot.lane.b32.xlu0 %v2528_v40, %s2760_s8 }
 0x1c3   : > { %v1174_v7 = vpop.permute.xlu1 %1173  ;;  %v1142_v51 = vpop.permute.xlu0 %1141  ;;  %v1851_v17 = vld [vmem:[#allocation2 + $0x20] sm:$0xff] }
 0x1c4   : > { %v1867_v56 = vld [vmem:[#allocation2 + $0xa0] sm:$0xff]  ;;  %1248 = vst.msk [vmem:[#allocation2 + $0xb0] sm:$0xff] %vm1225_vm6, %v1174_v7  ;;  %1232 = vst.msk [vmem:[#allocation2 + $0x30] sm:$0xff] %vm1225_vm6, %v1142_v51  ;;  %2640 = vmatprep.mubr.msk.f32.mxu0 %vm1887_vm10, %v1851_v17 }
 0x1c5   : > { %2664 = vmatprep.mubr.msk.f32.mxu1 %vm1887_vm10, %v1867_v56  ;;  %994 = vrot.lane.b32.xlu1 %v2513_v10, %s2756_s23  ;;  %v2548_v17 = vld [vmem:[%s2805_s19 + $0x19a] sm:$0xff] }
 0x1c6   : > { %962 = vrot.lane.b32.xlu0 %v2497_v63, %s2756_s23  ;;  %v2532_v56 = vld [vmem:[%s2805_s19 + $0xda] sm:$0xff] }
 0x1c7   : > { %v1752_v57 = vpop.permute.xlu1 %1751  ;;  %v1720_v28 = vpop.permute.xlu0 %1719 }
 0x1c8   : > { %1827 = vst.msk [vmem:[#allocation2 + $0xa8] sm:$0xff] %vm1805_vm9, %v1752_v57  ;;  %1811 = vst.msk [vmem:[#allocation2 + $0x28] sm:$0xff] %vm1805_vm9, %v1720_v28 }
 0x1c9   : > { %1185 = vrot.lane.b32.xlu1 %v2544_v22, %s2757_s24 }
 0x1ca   : > { %1153 = vrot.lane.b32.xlu0 %v2528_v40, %s2757_s24 }
 0x1cb   : > { %v1176_v14 = vpop.permute.xlu1 %1175  ;;  %v1144_v15 = vpop.permute.xlu0 %1143 }
 0x1cc   : > { %1249 = vst.msk [vmem:[#allocation2 + $0xb8] sm:$0xff] %vm1225_vm6, %v1176_v14  ;;  %1233 = vst.msk [vmem:[#allocation2 + $0x38] sm:$0xff] %vm1225_vm6, %v1144_v15 }
 0x1cd   : > { %1763 = vrot.lane.b32.xlu1 %v2545_v6, %s2760_s8 }
 0x1ce   : > { %1731 = vrot.lane.b32.xlu0 %v2529_v50, %s2760_s8 }
 0x1cf   : > { %v1368_v31 = vpop.permute.xlu1 %1367  ;;  %v1336_v0 = vpop.permute.xlu0 %1335  ;;  %v1852_v13 = vld [vmem:[#allocation2 + $0x28] sm:$0xff] }
 0x1d0   : > { %v1868_v3 = vld [vmem:[#allocation2 + $0xa8] sm:$0xff]  ;;  %1442 = vst.msk [vmem:[#allocation2 + $0xb0] sm:$0xff] %vm1419_vm7, %v1368_v31  ;;  %1426 = vst.msk [vmem:[#allocation2 + $0x30] sm:$0xff] %vm1419_vm7, %v1336_v0  ;;  %2641 = vmatmul.mubr.msk.f32.gmra.mrb[4].mxu0 %vm1887_vm10, %v1852_v13 }
 0x1d1   : > { %2665 = vmatmul.mubr.msk.f32.gmra.mrb[4].mxu1 %vm1887_vm10, %v1868_v3  ;;  %1187 = vrot.lane.b32.xlu1 %v2545_v6, %s2757_s24  ;;  %v2549_v6 = vld [vmem:[%s2805_s19 + $0x1a2] sm:$0xff] }
 0x1d2   : > { %1155 = vrot.lane.b32.xlu0 %v2529_v50, %s2757_s24  ;;  %v2533_v50 = vld [vmem:[%s2805_s19 + $0xe2] sm:$0xff] }
 0x1d3   : > { %v1370_v2 = vpop.permute.xlu1 %1369  ;;  %v1338_v53 = vpop.permute.xlu0 %1337 }
 0x1d4   : > { %1443 = vst.msk [vmem:[#allocation2 + $0xb8] sm:$0xff] %vm1419_vm7, %v1370_v2  ;;  %1427 = vst.msk [vmem:[#allocation2 + $0x38] sm:$0xff] %vm1419_vm7, %v1338_v53 }
 0x1d5   : > { %1379 = vrot.lane.b32.xlu1 %v2482_v45, %s2758_s25 }
 0x1d6   : > { %1347 = vrot.lane.b32.xlu0 %v2466_v25, %s2758_s25 }
 0x1d7   : > { %v1561_v44 = vpop.permute.xlu1 %1560  ;;  %v1529_v24 = vpop.permute.xlu0 %1528 }
 0x1d8   : > { %1635 = vst.msk [vmem:[#allocation2 + $0xb0] sm:$0xff] %vm1612_vm8, %v1561_v44  ;;  %1619 = vst.msk [vmem:[#allocation2 + $0x30] sm:$0xff] %vm1612_vm8, %v1529_v24 }
 0x1d9   : > { %1381 = vrot.lane.b32.xlu1 %v2483_v43, %s2758_s25 }
 0x1da   : > { %1349 = vrot.lane.b32.xlu0 %v2467_v52, %s2758_s25 }
 0x1db   : > { %v985_v9 = vpop.permute.xlu1 %984  ;;  %v953_v8 = vpop.permute.xlu0 %952 }
 0x1dc   : > { %1057 = vst.msk [vmem:[#allocation2 + $0xc0] sm:$0xff] %vm1032_vm5, %v985_v9  ;;  %1041 = vst.msk [vmem:[#allocation2 + $0x40] sm:$0xff] %vm1032_vm5, %v953_v8 }
 0x1dd   : > { %1572 = vrot.lane.b32.xlu1 %v2514_v32, %s2759_s26 }
 0x1de   : > { %1540 = vrot.lane.b32.xlu0 %v2498_v42, %s2759_s26 }
 0x1df   : > { %v1563_v62 = vpop.permute.xlu1 %1562  ;;  %v1531_v20 = vpop.permute.xlu0 %1530 }
 0x1e0   : > { %1636 = vst.msk [vmem:[#allocation2 + $0xb8] sm:$0xff] %vm1612_vm8, %v1563_v62  ;;  %1620 = vst.msk [vmem:[#allocation2 + $0x38] sm:$0xff] %vm1612_vm8, %v1531_v20 }
 0x1e1   : > { %996 = vrot.lane.b32.xlu1 %v2514_v32, %s2756_s23 }
 0x1e2   : > { %964 = vrot.lane.b32.xlu0 %v2498_v42, %s2756_s23 }
 0x1e3   : > { %v1754_v39 = vpop.permute.xlu1 %1753  ;;  %v1722_v5 = vpop.permute.xlu0 %1721 }
 0x1e4   : > { %1828 = vst.msk [vmem:[#allocation2 + $0xb0] sm:$0xff] %vm1805_vm9, %v1754_v39  ;;  %1812 = vst.msk [vmem:[#allocation2 + $0x30] sm:$0xff] %vm1805_vm9, %v1722_v5 }
 0x1e5   : > { %1574 = vrot.lane.b32.xlu1 %v2515_v61, %s2759_s26 }
 0x1e6   : > { %1542 = vrot.lane.b32.xlu0 %v2499_v19, %s2759_s26 }
 0x1e7   : > { %v987_v47 = vpop.permute.xlu1 %986 }
 0x1e8   : > { %v955_v34 = vpop.permute.xlu0 %954  ;;  %1058 = vst.msk [vmem:[#allocation2 + $0xc8] sm:$0xff] %vm1032_vm5, %v987_v47 }
 0x1e9   : > { %1042 = vst.msk [vmem:[#allocation2 + $0x48] sm:$0xff] %vm1032_vm5, %v955_v34  ;;  %1765 = vrot.lane.b32.xlu1 %v2546_v38, %s2760_s8 }
 0x1ea   : > { %1733 = vrot.lane.b32.xlu0 %v2530_v33, %s2760_s8 }
 0x1eb   : > { %v1178_v35 = vpop.permute.xlu1 %1177  ;;  %v1853_v37 = vld [vmem:[#allocation2 + $0x30] sm:$0xff] }
 0x1ec   : > { %v1146_v36 = vpop.permute.xlu0 %1145  ;;  %v1869_v21 = vld [vmem:[#allocation2 + $0xb0] sm:$0xff]  ;;  %1250 = vst.msk [vmem:[#allocation2 + $0xc0] sm:$0xff] %vm1225_vm6, %v1178_v35  ;;  %2643 = vmatprep.mubr.msk.f32.mxu0 %vm1887_vm10, %v1853_v37 }
 0x1ed   : > { %1234 = vst.msk [vmem:[#allocation2 + $0x40] sm:$0xff] %vm1225_vm6, %v1146_v36  ;;  %2667 = vmatprep.mubr.msk.f32.mxu1 %vm1887_vm10, %v1869_v21  ;;  %998 = vrot.lane.b32.xlu1 %v2515_v61, %s2756_s23 }
 0x1ee   : > { %966 = vrot.lane.b32.xlu0 %v2499_v19, %s2756_s23 }
 0x1ef   : > { %v1756_v30 = vpop.permute.xlu1 %1755 }
 0x1f0   : > { %v1724_v12 = vpop.permute.xlu0 %1723  ;;  %1829 = vst.msk [vmem:[#allocation2 + $0xb8] sm:$0xff] %vm1805_vm9, %v1756_v30 }
 0x1f1   : > { %1813 = vst.msk [vmem:[#allocation2 + $0x38] sm:$0xff] %vm1805_vm9, %v1724_v12  ;;  %1189 = vrot.lane.b32.xlu1 %v2546_v38, %s2757_s24 }
 0x1f2   : > { %1157 = vrot.lane.b32.xlu0 %v2530_v33, %s2757_s24 }
 0x1f3   : > { %v1180_v4 = vpop.permute.xlu1 %1179 }
 0x1f4   : > { %v1148_v49 = vpop.permute.xlu0 %1147  ;;  %1251 = vst.msk [vmem:[#allocation2 + $0xc8] sm:$0xff] %vm1225_vm6, %v1180_v4 }
 0x1f5   : > { %1235 = vst.msk [vmem:[#allocation2 + $0x48] sm:$0xff] %vm1225_vm6, %v1148_v49  ;;  %1767 = vrot.lane.b32.xlu1 %v2547_v16, %s2760_s8 }
 0x1f6   : > { %1735 = vrot.lane.b32.xlu0 %v2531_v59, %s2760_s8 }
 0x1f7   : > { %v1372_v46 = vpop.permute.xlu1 %1371  ;;  %v1870_v48 = vld [vmem:[#allocation2 + $0xb8] sm:$0xff] }
 0x1f8   : > { %v1340_v60 = vpop.permute.xlu0 %1339  ;;  %v1854_v27 = vld [vmem:[#allocation2 + $0x38] sm:$0xff]  ;;  %1444 = vst.msk [vmem:[#allocation2 + $0xc0] sm:$0xff] %vm1419_vm7, %v1372_v46  ;;  %2668 = vmatmul.mubr.msk.f32.gmra.mrb[6].mxu1 %vm1887_vm10, %v1870_v48 }
 0x1f9   : > { %1428 = vst.msk [vmem:[#allocation2 + $0x40] sm:$0xff] %vm1419_vm7, %v1340_v60  ;;  %2644 = vmatmul.mubr.msk.f32.gmra.mrb[6].mxu0 %vm1887_vm10, %v1854_v27  ;;  %1191 = vrot.lane.b32.xlu1 %v2547_v16, %s2757_s24 }
 0x1fa   : > { %1159 = vrot.lane.b32.xlu0 %v2531_v59, %s2757_s24 }
 0x1fb   : > { %v1374_v11 = vpop.permute.xlu1 %1373 }
 0x1fc   : > { %v1342_v1 = vpop.permute.xlu0 %1341  ;;  %1445 = vst.msk [vmem:[#allocation2 + $0xc8] sm:$0xff] %vm1419_vm7, %v1374_v11 }
 0x1fd   : > { %1429 = vst.msk [vmem:[#allocation2 + $0x48] sm:$0xff] %vm1419_vm7, %v1342_v1  ;;  %1383 = vrot.lane.b32.xlu1 %v2484_v26, %s2758_s25  ;;  %v3794_v26 = vld [vmem:[%s3910_s2] ss:$0 sm:$0xff] }
 0x1fe   : > { %1351 = vrot.lane.b32.xlu0 %v2468_v54, %s2758_s25 }
 0x1ff   : > { %v1565_v10 = vpop.permute.xlu1 %1564 }
 0x200   : > { %v1533_v63 = vpop.permute.xlu0 %1532  ;;  %1637 = vst.msk [vmem:[#allocation2 + $0xc0] sm:$0xff] %vm1612_vm8, %v1565_v10 }
 0x201   : > { %1621 = vst.msk [vmem:[#allocation2 + $0x40] sm:$0xff] %vm1612_vm8, %v1533_v63  ;;  %1385 = vrot.lane.b32.xlu1 %v2485_v58, %s2758_s25 }
 0x202   : > { %1353 = vrot.lane.b32.xlu0 %v2469_v29, %s2758_s25 }
 0x203   : > { %v989_v22 = vpop.permute.xlu1 %988 }
 0x204   : > { %v957_v40 = vpop.permute.xlu0 %956  ;;  %1059 = vst.msk [vmem:[#allocation2 + $0xd0] sm:$0xff] %vm1032_vm5, %v989_v22 }
 0x205   : > { %1043 = vst.msk [vmem:[#allocation2 + $0x50] sm:$0xff] %vm1032_vm5, %v957_v40  ;;  %1576 = vrot.lane.b32.xlu1 %v2516_v23, %s2759_s26 }
 0x206   : > { %1544 = vrot.lane.b32.xlu0 %v2500_v41, %s2759_s26 }
 0x207   : > { %v1567_v7 = vpop.permute.xlu1 %1566 }
 0x208   : > { %v1535_v51 = vpop.permute.xlu0 %1534  ;;  %1638 = vst.msk [vmem:[#allocation2 + $0xc8] sm:$0xff] %vm1612_vm8, %v1567_v7 }
 0x209   : > { %1622 = vst.msk [vmem:[#allocation2 + $0x48] sm:$0xff] %vm1612_vm8, %v1535_v51  ;;  %1578 = vrot.lane.b32.xlu1 %v2517_v18, %s2759_s26 }
 0x20a   : > { %1546 = vrot.lane.b32.xlu0 %v2501_v55, %s2759_s26 }
 0x20b   : > { %v1758_v57 = vpop.permute.xlu1 %1757 }
 0x20c   : > { %v1726_v28 = vpop.permute.xlu0 %1725  ;;  %1830 = vst.msk [vmem:[#allocation2 + $0xc0] sm:$0xff] %vm1805_vm9, %v1758_v57 }
 0x20d   : > { %1814 = vst.msk [vmem:[#allocation2 + $0x40] sm:$0xff] %vm1805_vm9, %v1726_v28  ;;  %1769 = vrot.lane.b32.xlu1 %v2548_v17, %s2760_s8 }
 0x20e   : > { %1737 = vrot.lane.b32.xlu0 %v2532_v56, %s2760_s8 }
 0x20f   : > { %v991_v14 = vpop.permute.xlu1 %990 }
 0x210   : > { %v959_v15 = vpop.permute.xlu0 %958  ;;  %1060 = vst.msk [vmem:[#allocation2 + $0xd8] sm:$0xff] %vm1032_vm5, %v991_v14 }
 0x211   : > { %1044 = vst.msk [vmem:[#allocation2 + $0x58] sm:$0xff] %vm1032_vm5, %v959_v15  ;;  %1771 = vrot.lane.b32.xlu1 %v2549_v6, %s2760_s8 }
 0x212   : > { %1739 = vrot.lane.b32.xlu0 %v2533_v50, %s2760_s8 }
 0x213   : > { %v1182_v31 = vpop.permute.xlu1 %1181  ;;  %v1871_v3 = vld [vmem:[#allocation2 + $0xc0] sm:$0xff] }
 0x214   : > { %v1150_v0 = vpop.permute.xlu0 %1149  ;;  %v1855_v13 = vld [vmem:[#allocation2 + $0x40] sm:$0xff]  ;;  %1252 = vst.msk [vmem:[#allocation2 + $0xd0] sm:$0xff] %vm1225_vm6, %v1182_v31  ;;  %2670 = vmatprep.mubr.msk.f32.mxu1 %vm1887_vm10, %v1871_v3 }
 0x215   : > { %1236 = vst.msk [vmem:[#allocation2 + $0x50] sm:$0xff] %vm1225_vm6, %v1150_v0  ;;  %2646 = vmatprep.mubr.msk.f32.mxu0 %vm1887_vm10, %v1855_v13 }
 0x217   : > { %v1760_v45 = vpop.permute.xlu1 %1759 }
 0x218   : > { %v1728_v25 = vpop.permute.xlu0 %1727  ;;  %1831 = vst.msk [vmem:[#allocation2 + $0xc8] sm:$0xff] %vm1805_vm9, %v1760_v45 }
 0x219   : > { %1815 = vst.msk [vmem:[#allocation2 + $0x48] sm:$0xff] %vm1805_vm9, %v1728_v25 }
 0x21b   : > { %v1184_v2 = vpop.permute.xlu1 %1183 }
 0x21c   : > { %v1152_v53 = vpop.permute.xlu0 %1151  ;;  %1253 = vst.msk [vmem:[#allocation2 + $0xd8] sm:$0xff] %vm1225_vm6, %v1184_v2 }
 0x21d   : > { %1237 = vst.msk [vmem:[#allocation2 + $0x58] sm:$0xff] %vm1225_vm6, %v1152_v53 }
 0x21f   : > { %v1376_v43 = vpop.permute.xlu1 %1375  ;;  %v1872_v24 = vld [vmem:[#allocation2 + $0xc8] sm:$0xff] }
 0x220   : > { %v1344_v52 = vpop.permute.xlu0 %1343  ;;  %v1856_v44 = vld [vmem:[#allocation2 + $0x48] sm:$0xff]  ;;  %1446 = vst.msk [vmem:[#allocation2 + $0xd0] sm:$0xff] %vm1419_vm7, %v1376_v43  ;;  %2671 = vmatmul.mubr.msk.f32.gmra.mrb[8].mxu1 %vm1887_vm10, %v1872_v24 }
 0x221   : > { %1430 = vst.msk [vmem:[#allocation2 + $0x50] sm:$0xff] %vm1419_vm7, %v1344_v52  ;;  %2647 = vmatmul.mubr.msk.f32.gmra.mrb[8].mxu0 %vm1887_vm10, %v1856_v44 }
 0x223   : > { %v1378_v32 = vpop.permute.xlu1 %1377 }
 0x224   : > { %v1346_v42 = vpop.permute.xlu0 %1345  ;;  %1447 = vst.msk [vmem:[#allocation2 + $0xd8] sm:$0xff] %vm1419_vm7, %v1378_v32 }
 0x225   : > { %1431 = vst.msk [vmem:[#allocation2 + $0x58] sm:$0xff] %vm1419_vm7, %v1346_v42 }
 0x227   : > { %v1569_v9 = vpop.permute.xlu1 %1568 }
 0x228   : > { %v1537_v8 = vpop.permute.xlu0 %1536  ;;  %1639 = vst.msk [vmem:[#allocation2 + $0xd0] sm:$0xff] %vm1612_vm8, %v1569_v9 }
 0x229   : > { %1623 = vst.msk [vmem:[#allocation2 + $0x50] sm:$0xff] %vm1612_vm8, %v1537_v8 }
 0x22b   : > { %v993_v62 = vpop.permute.xlu1 %992 }
 0x22c   : > { %v961_v20 = vpop.permute.xlu0 %960  ;;  %1061 = vst.msk [vmem:[#allocation2 + $0xe0] sm:$0xff] %vm1032_vm5, %v993_v62 }
 0x22d   : > { %1045 = vst.msk [vmem:[#allocation2 + $0x60] sm:$0xff] %vm1032_vm5, %v961_v20 }
 0x22f   : > { %v1571_v61 = vpop.permute.xlu1 %1570 }
 0x230   : > { %v1539_v19 = vpop.permute.xlu0 %1538  ;;  %1640 = vst.msk [vmem:[#allocation2 + $0xd8] sm:$0xff] %vm1612_vm8, %v1571_v61 }
 0x231   : > { %1624 = vst.msk [vmem:[#allocation2 + $0x58] sm:$0xff] %vm1612_vm8, %v1539_v19 }
 0x233   : > { %v1762_v39 = vpop.permute.xlu1 %1761 }
 0x234   : > { %v1730_v5 = vpop.permute.xlu0 %1729  ;;  %1832 = vst.msk [vmem:[#allocation2 + $0xd0] sm:$0xff] %vm1805_vm9, %v1762_v39 }
 0x235   : > { %1816 = vst.msk [vmem:[#allocation2 + $0x50] sm:$0xff] %vm1805_vm9, %v1730_v5 }
 0x237   : > { %v995_v38 = vpop.permute.xlu1 %994 }
 0x238   : > { %v963_v33 = vpop.permute.xlu0 %962  ;;  %1062 = vst.msk [vmem:[#allocation2 + $0xe8] sm:$0xff] %vm1032_vm5, %v995_v38 }
 0x239   : > { %1046 = vst.msk [vmem:[#allocation2 + $0x68] sm:$0xff] %vm1032_vm5, %v963_v33 }
 0x23b   : > { %v1186_v47 = vpop.permute.xlu1 %1185  ;;  %v1873_v36 = vld [vmem:[#allocation2 + $0xd0] sm:$0xff] }
 0x23c   : > { %v1154_v34 = vpop.permute.xlu0 %1153  ;;  %v1857_v35 = vld [vmem:[#allocation2 + $0x50] sm:$0xff]  ;;  %1254 = vst.msk [vmem:[#allocation2 + $0xe0] sm:$0xff] %vm1225_vm6, %v1186_v47  ;;  %2673 = vmatprep.mubr.msk.f32.mxu1 %vm1887_vm10, %v1873_v36 }
 0x23d   : > { %1238 = vst.msk [vmem:[#allocation2 + $0x60] sm:$0xff] %vm1225_vm6, %v1154_v34  ;;  %2649 = vmatprep.mubr.msk.f32.mxu0 %vm1887_vm10, %v1857_v35 }
 0x23f   : > { %v1764_v37 = vpop.permute.xlu1 %1763 }
 0x240   : > { %v1732_v21 = vpop.permute.xlu0 %1731  ;;  %1833 = vst.msk [vmem:[#allocation2 + $0xd8] sm:$0xff] %vm1805_vm9, %v1764_v37 }
 0x241   : > { %1817 = vst.msk [vmem:[#allocation2 + $0x58] sm:$0xff] %vm1805_vm9, %v1732_v21 }
 0x243   : > { %v1188_v30 = vpop.permute.xlu1 %1187 }
 0x244   : > { %v1156_v12 = vpop.permute.xlu0 %1155  ;;  %1255 = vst.msk [vmem:[#allocation2 + $0xe8] sm:$0xff] %vm1225_vm6, %v1188_v30 }
 0x245   : > { %1239 = vst.msk [vmem:[#allocation2 + $0x68] sm:$0xff] %vm1225_vm6, %v1156_v12 }
 0x247   : > { %v1380_v16 = vpop.permute.xlu1 %1379  ;;  %v1874_v49 = vld [vmem:[#allocation2 + $0xd8] sm:$0xff] }
 0x248   : > { %v1348_v59 = vpop.permute.xlu0 %1347  ;;  %v1858_v4 = vld [vmem:[#allocation2 + $0x58] sm:$0xff]  ;;  %1448 = vst.msk [vmem:[#allocation2 + $0xe0] sm:$0xff] %vm1419_vm7, %v1380_v16  ;;  %2674 = vmatmul.mubr.msk.f32.gmra.mrb[10].mxu1 %vm1887_vm10, %v1874_v49 }
 0x249   : > { %1432 = vst.msk [vmem:[#allocation2 + $0x60] sm:$0xff] %vm1419_vm7, %v1348_v59  ;;  %2650 = vmatmul.mubr.msk.f32.gmra.mrb[10].mxu0 %vm1887_vm10, %v1858_v4 }
 0x24b   : > { %v1382_v46 = vpop.permute.xlu1 %1381 }
 0x24c   : > { %v1350_v60 = vpop.permute.xlu0 %1349  ;;  %1449 = vst.msk [vmem:[#allocation2 + $0xe8] sm:$0xff] %vm1419_vm7, %v1382_v46 }
 0x24d   : > { %1433 = vst.msk [vmem:[#allocation2 + $0x68] sm:$0xff] %vm1419_vm7, %v1350_v60 }
 0x24f   : > { %v1573_v27 = vpop.permute.xlu1 %1572 }
 0x250   : > { %v1541_v48 = vpop.permute.xlu0 %1540  ;;  %1641 = vst.msk [vmem:[#allocation2 + $0xe0] sm:$0xff] %vm1612_vm8, %v1573_v27 }
 0x251   : > { %1625 = vst.msk [vmem:[#allocation2 + $0x60] sm:$0xff] %vm1612_vm8, %v1541_v48 }
 0x253   : > { %v997_v54 = vpop.permute.xlu1 %996  ;;  %v2636_v1 = vpop.f32.mrb[0].mxu0 }
 0x254   : > { %v965_v11 = vpop.permute.xlu0 %964  ;;  %1063 = vst.msk [vmem:[#allocation2 + $0xf0] sm:$0xff] %vm1032_vm5, %v997_v54  ;;  %v2660_v58 = vpop.f32.mrb[0].mxu1  ;;  %v2060_v29 = vadd.f32 %v2636_v1, %v3794_v26 }
 0x255   : > { %1047 = vst.msk [vmem:[#allocation2 + $0x70] sm:$0xff] %vm1032_vm5, %v965_v11  ;;  %v2140_v10 = vadd.f32 %v2660_v58, %v3794_v26  ;;  %v2054_v63 = vpop.f32.mrb[1].mxu0  ;;  %v2134_v23 = vpop.f32.mrb[1].mxu1 }
 0x256   : > { %v2055_v41 = vadd.f32 %v3794_v26, %v2054_v63  ;;  %v2135_v22 = vadd.f32 %v3794_v26, %v2134_v23  ;;  %2214 = vst [vmem:[%s3801_s20 + $0x8] sm:$0xff] %v2060_v29 }
 0x257   : > { %2230 = vst [vmem:[%s3801_s20 + $0x88] sm:$0xff] %v2140_v10  ;;  %v1575_v40 = vpop.permute.xlu1 %1574 }
 0x258   : > { %v1543_v18 = vpop.permute.xlu0 %1542  ;;  %2213 = vst [vmem:[%s3801_s20] sm:$0xff] %v2055_v41  ;;  %2229 = vst [vmem:[%s3801_s20 + $0x80] sm:$0xff] %v2135_v22 }
 0x259   : > { %1642 = vst.msk [vmem:[#allocation2 + $0xe8] sm:$0xff] %vm1612_vm8, %v1575_v40  ;;  %1626 = vst.msk [vmem:[#allocation2 + $0x68] sm:$0xff] %vm1612_vm8, %v1543_v18 }
 0x25b   : > { %v1766_v55 = vpop.permute.xlu1 %1765 }
 0x25c   : > { %v1734_v7 = vpop.permute.xlu0 %1733  ;;  %1834 = vst.msk [vmem:[#allocation2 + $0xe0] sm:$0xff] %vm1805_vm9, %v1766_v55 }
 0x25d   : > { %1818 = vst.msk [vmem:[#allocation2 + $0x60] sm:$0xff] %vm1805_vm9, %v1734_v7 }
 0x25f   : > { %v999_v51 = vpop.permute.xlu1 %998 }
 0x260   : > { %v967_v17 = vpop.permute.xlu0 %966  ;;  %1064 = vst.msk [vmem:[#allocation2 + $0xf8] sm:$0xff] %vm1032_vm5, %v999_v51 }
 0x261   : > { %1048 = vst.msk [vmem:[#allocation2 + $0x78] sm:$0xff] %vm1032_vm5, %v967_v17 }
 0x263   : > { %v1190_v56 = vpop.permute.xlu1 %1189  ;;  %v1875_v6 = vld [vmem:[#allocation2 + $0xe0] sm:$0xff] }
 0x264   : > { %v1158_v57 = vpop.permute.xlu0 %1157  ;;  %v1859_v28 = vld [vmem:[#allocation2 + $0x60] sm:$0xff]  ;;  %1256 = vst.msk [vmem:[#allocation2 + $0xf0] sm:$0xff] %vm1225_vm6, %v1190_v56  ;;  %2676 = vmatprep.mubr.msk.f32.mxu1 %vm1887_vm10, %v1875_v6 }
 0x265   : > { %1240 = vst.msk [vmem:[#allocation2 + $0x70] sm:$0xff] %vm1225_vm6, %v1158_v57  ;;  %2652 = vmatprep.mubr.msk.f32.mxu0 %vm1887_vm10, %v1859_v28 }
 0x267   : > { %v1768_v50 = vpop.permute.xlu1 %1767 }
 0x268   : > { %v1736_v14 = vpop.permute.xlu0 %1735  ;;  %1835 = vst.msk [vmem:[#allocation2 + $0xe8] sm:$0xff] %vm1805_vm9, %v1768_v50 }
 0x269   : > { %1819 = vst.msk [vmem:[#allocation2 + $0x68] sm:$0xff] %vm1805_vm9, %v1736_v14 }
 0x26b   : > { %v1192_v15 = vpop.permute.xlu1 %1191 }
 0x26c   : > { %v1160_v31 = vpop.permute.xlu0 %1159  ;;  %1257 = vst.msk [vmem:[#allocation2 + $0xf8] sm:$0xff] %vm1225_vm6, %v1192_v15 }
 0x26d   : > { %1241 = vst.msk [vmem:[#allocation2 + $0x78] sm:$0xff] %vm1225_vm6, %v1160_v31 }
 0x26f   : > { %v1384_v0 = vpop.permute.xlu1 %1383  ;;  %v1876_v45 = vld [vmem:[#allocation2 + $0xe8] sm:$0xff] }
 0x270   : > { %v1352_v13 = vpop.permute.xlu0 %1351  ;;  %v1860_v3 = vld [vmem:[#allocation2 + $0x68] sm:$0xff]  ;;  %1450 = vst.msk [vmem:[#allocation2 + $0xf0] sm:$0xff] %vm1419_vm7, %v1384_v0  ;;  %2677 = vmatmul.mubr.msk.f32.gmra.mrb[12].mxu1 %vm1887_vm10, %v1876_v45 }
 0x271   : > { %1434 = vst.msk [vmem:[#allocation2 + $0x70] sm:$0xff] %vm1419_vm7, %v1352_v13  ;;  %2653 = vmatmul.mubr.msk.f32.gmra.mrb[12].mxu0 %vm1887_vm10, %v1860_v3 }
 0x273   : > { %v1386_v25 = vpop.permute.xlu1 %1385 }
 0x274   : > { %v1354_v2 = vpop.permute.xlu0 %1353  ;;  %1451 = vst.msk [vmem:[#allocation2 + $0xf8] sm:$0xff] %vm1419_vm7, %v1386_v25 }
 0x275   : > { %1435 = vst.msk [vmem:[#allocation2 + $0x78] sm:$0xff] %vm1419_vm7, %v1354_v2 }
 0x277   : > { %v1577_v53 = vpop.permute.xlu1 %1576 }
 0x278   : > { %v1545_v43 = vpop.permute.xlu0 %1544  ;;  %1643 = vst.msk [vmem:[#allocation2 + $0xf0] sm:$0xff] %vm1612_vm8, %v1577_v53 }
 0x279   : > { %1627 = vst.msk [vmem:[#allocation2 + $0x70] sm:$0xff] %vm1612_vm8, %v1545_v43 }
 0x27b   : > { %v1579_v52 = vpop.permute.xlu1 %1578  ;;  %v2639_v24 = vpop.f32.mrb[2].mxu0 }
 0x27c   : > { %v1547_v44 = vpop.permute.xlu0 %1546  ;;  %1644 = vst.msk [vmem:[#allocation2 + $0xf8] sm:$0xff] %vm1612_vm8, %v1579_v52  ;;  %v2663_v32 = vpop.f32.mrb[2].mxu1  ;;  %v2070_v42 = vadd.f32 %v2639_v24, %v3794_v26 }
 0x27d   : > { %1628 = vst.msk [vmem:[#allocation2 + $0x78] sm:$0xff] %vm1612_vm8, %v1547_v44  ;;  %v2150_v9 = vadd.f32 %v2663_v32, %v3794_v26  ;;  %v2064_v8 = vpop.f32.mrb[3].mxu0  ;;  %v2144_v62 = vpop.f32.mrb[3].mxu1 }
 0x27e   : > { %v2065_v20 = vadd.f32 %v3794_v26, %v2064_v8  ;;  %v2145_v61 = vadd.f32 %v3794_v26, %v2144_v62  ;;  %2216 = vst [vmem:[%s3801_s20 + $0x18] sm:$0xff] %v2070_v42 }
 0x27f   : > { %2232 = vst [vmem:[%s3801_s20 + $0x98] sm:$0xff] %v2150_v9  ;;  %v1770_v19 = vpop.permute.xlu1 %1769 }
 0x280   : > { %v1738_v39 = vpop.permute.xlu0 %1737  ;;  %2215 = vst [vmem:[%s3801_s20 + $0x10] sm:$0xff] %v2065_v20  ;;  %2231 = vst [vmem:[%s3801_s20 + $0x90] sm:$0xff] %v2145_v61 }
 0x281   : > { %1836 = vst.msk [vmem:[#allocation2 + $0xf0] sm:$0xff] %vm1805_vm9, %v1770_v19  ;;  %1820 = vst.msk [vmem:[#allocation2 + $0x70] sm:$0xff] %vm1805_vm9, %v1738_v39 }
 0x283   : > { %v1772_v5 = vpop.permute.xlu1 %1771 }
 0x284   : > { %v1740_v38 = vpop.permute.xlu0 %1739  ;;  %1837 = vst.msk [vmem:[#allocation2 + $0xf8] sm:$0xff] %vm1805_vm9, %v1772_v5 }
 0x285   : > { %1821 = vst.msk [vmem:[#allocation2 + $0x78] sm:$0xff] %vm1805_vm9, %v1740_v38 }
 0x288   : > { %v1861_v33 = vld [vmem:[#allocation2 + $0x70] sm:$0xff] }
 0x289   : > { %v1877_v47 = vld [vmem:[#allocation2 + $0xf0] sm:$0xff]  ;;  %2655 = vmatprep.mubr.msk.f32.mxu0 %vm1887_vm10, %v1861_v33 }
 0x28a   : > { %2679 = vmatprep.mubr.msk.f32.mxu1 %vm1887_vm10, %v1877_v47 }
 0x28b   : > { %v1878_v35 = vld [vmem:[#allocation2 + $0xf8] sm:$0xff] }
 0x28c   : > { %v1862_v34 = vld [vmem:[#allocation2 + $0x78] sm:$0xff]  ;;  %2680 = vmatmul.mubr.msk.f32.gmra.mrb[14].mxu1 %vm1887_vm10, %v1878_v35 }
 0x28d   : > { %2656 = vmatmul.mubr.msk.f32.gmra.mrb[14].mxu0 %vm1887_vm10, %v1862_v34 }
 0x2a3   : > { %v2642_v36 = vpop.f32.mrb[4].mxu0 }
 0x2a4   : > { %v2666_v37 = vpop.f32.mrb[4].mxu1  ;;  %v2080_v21 = vadd.f32 %v2642_v36, %v3794_v26  ;;  %v2074_v12 = vpop.f32.mrb[5].mxu0 }
 0x2a5   : > { %v2160_v30 = vadd.f32 %v2666_v37, %v3794_v26  ;;  %v2154_v16 = vpop.f32.mrb[5].mxu1  ;;  %v2075_v59 = vadd.f32 %v3794_v26, %v2074_v12 }
 0x2a6   : > { %v2155_v4 = vadd.f32 %v3794_v26, %v2154_v16  ;;  %2218 = vst [vmem:[%s3801_s20 + $0x28] sm:$0xff] %v2080_v21 }
 0x2a7   : > { %2234 = vst [vmem:[%s3801_s20 + $0xa8] sm:$0xff] %v2160_v30  ;;  %2217 = vst [vmem:[%s3801_s20 + $0x20] sm:$0xff] %v2075_v59 }
 0x2a8   : > { %2233 = vst [vmem:[%s3801_s20 + $0xa0] sm:$0xff] %v2155_v4 }
 0x2cb   : > { %v2669_v46 = vpop.f32.mrb[6].mxu1 }
 0x2cc   : > { %v2645_v49 = vpop.f32.mrb[6].mxu0  ;;  %v2170_v27 = vadd.f32 %v2669_v46, %v3794_v26  ;;  %v2164_v54 = vpop.f32.mrb[7].mxu1 }
 0x2cd   : > { %v2090_v60 = vadd.f32 %v2645_v49, %v3794_v26  ;;  %v2084_v48 = vpop.f32.mrb[7].mxu0  ;;  %v2165_v1 = vadd.f32 %v3794_v26, %v2164_v54 }
 0x2ce   : > { %v2085_v11 = vadd.f32 %v3794_v26, %v2084_v48  ;;  %2236 = vst [vmem:[%s3801_s20 + $0xb8] sm:$0xff] %v2170_v27 }
 0x2cf   : > { %2220 = vst [vmem:[%s3801_s20 + $0x38] sm:$0xff] %v2090_v60  ;;  %2235 = vst [vmem:[%s3801_s20 + $0xb0] sm:$0xff] %v2165_v1 }
 0x2d0   : > { %2219 = vst [vmem:[%s3801_s20 + $0x30] sm:$0xff] %v2085_v11 }
 0x2f3   : > { %v2672_v29 = vpop.f32.mrb[8].mxu1 }
 0x2f4   : > { %v2648_v58 = vpop.f32.mrb[8].mxu0  ;;  %v2180_v63 = vadd.f32 %v2672_v29, %v3794_v26  ;;  %v2174_v41 = vpop.f32.mrb[9].mxu1 }
 0x2f5   : > { %v2100_v10 = vadd.f32 %v2648_v58, %v3794_v26  ;;  %v2094_v23 = vpop.f32.mrb[9].mxu0  ;;  %v2175_v40 = vadd.f32 %v3794_v26, %v2174_v41 }
 0x2f6   : > { %v2095_v22 = vadd.f32 %v3794_v26, %v2094_v23  ;;  %2238 = vst [vmem:[%s3801_s20 + $0xc8] sm:$0xff] %v2180_v63 }
 0x2f7   : > { %2222 = vst [vmem:[%s3801_s20 + $0x48] sm:$0xff] %v2100_v10  ;;  %2237 = vst [vmem:[%s3801_s20 + $0xc0] sm:$0xff] %v2175_v40 }
 0x2f8   : > { %2221 = vst [vmem:[%s3801_s20 + $0x40] sm:$0xff] %v2095_v22 }
 0x31b   : > { %v2675_v55 = vpop.f32.mrb[10].mxu1 }
 0x31c   : > { %v2651_v18 = vpop.f32.mrb[10].mxu0  ;;  %v2190_v51 = vadd.f32 %v2675_v55, %v3794_v26  ;;  %v2184_v56 = vpop.f32.mrb[11].mxu1 }
 0x31d   : > { %v2110_v7 = vadd.f32 %v2651_v18, %v3794_v26  ;;  %v2104_v17 = vpop.f32.mrb[11].mxu0  ;;  %v2185_v28 = vadd.f32 %v3794_v26, %v2184_v56 }
 0x31e   : > { %v2105_v57 = vadd.f32 %v3794_v26, %v2104_v17  ;;  %2240 = vst [vmem:[%s3801_s20 + $0xd8] sm:$0xff] %v2190_v51 }
 0x31f   : > { %2224 = vst [vmem:[%s3801_s20 + $0x58] sm:$0xff] %v2110_v7  ;;  %2239 = vst [vmem:[%s3801_s20 + $0xd0] sm:$0xff] %v2185_v28 }
 0x320   : > { %2223 = vst [vmem:[%s3801_s20 + $0x50] sm:$0xff] %v2105_v57 }
 0x343   : > { %v2678_v50 = vpop.f32.mrb[12].mxu1 }
 0x344   : > { %v2654_v6 = vpop.f32.mrb[12].mxu0  ;;  %v2200_v15 = vadd.f32 %v2678_v50, %v3794_v26  ;;  %v2194_v0 = vpop.f32.mrb[13].mxu1 }
 0x345   : > { %v2120_v14 = vadd.f32 %v2654_v6, %v3794_v26  ;;  %v2114_v31 = vpop.f32.mrb[13].mxu0  ;;  %v2195_v3 = vadd.f32 %v3794_v26, %v2194_v0 }
 0x346   : > { %v2115_v13 = vadd.f32 %v3794_v26, %v2114_v31  ;;  %2242 = vst [vmem:[%s3801_s20 + $0xe8] sm:$0xff] %v2200_v15 }
 0x347   : > { %2226 = vst [vmem:[%s3801_s20 + $0x68] sm:$0xff] %v2120_v14  ;;  %2241 = vst [vmem:[%s3801_s20 + $0xe0] sm:$0xff] %v2195_v3 }
 0x348   : > { %2225 = vst [vmem:[%s3801_s20 + $0x60] sm:$0xff] %v2115_v13 }
 0x35f   : > { %v2681_v25 = vpop.f32.mrb[14].mxu1 }
 0x360   : > { %v2657_v45 = vpop.f32.mrb[14].mxu0  ;;  %v2210_v53 = vadd.f32 %v2681_v25, %v3794_v26  ;;  %v2204_v52 = vpop.f32.mrb[15].mxu1 }
 0x361   : > { %v2130_v2 = vadd.f32 %v2657_v45, %v3794_v26  ;;  %v2124_v43 = vpop.f32.mrb[15].mxu0  ;;  %v2205_v24 = vadd.f32 %v3794_v26, %v2204_v52 }
 0x362   : > { %v2125_v44 = vadd.f32 %v3794_v26, %v2124_v43  ;;  %2244 = vst [vmem:[%s3801_s20 + $0xf8] sm:$0xff] %v2210_v53 }
 0x363   : > { %2228 = vst [vmem:[%s3801_s20 + $0x78] sm:$0xff] %v2130_v2  ;;  %2243 = vst [vmem:[%s3801_s20 + $0xf0] sm:$0xff] %v2205_v24 }
 0x364   : > { %2227 = vst [vmem:[%s3801_s20 + $0x70] sm:$0xff] %v2125_v44 }
 0x365 PF: > { %s13_s14 = sadd.s32 1, %s2751_s14   ;;  %s3926_s12 = smov %s2747_s13 }
 0x366   : > { %p10_p5 = scmp.ge.s32.totalorder %s13_s14, 4   ;;  %s3927_s13 = smov %s3929_s15 }
 0x368   :  { %12 = sbr.rel (!%p10_p5) target bundleno = 2 (0x2), region = 70 }

</bundles_post_ra>
